<compile_context>
chip_gen: v7x
topology: tpu7x:2x2x1
jax: 0.10.0
libtpu: 0.0.40
codegen_flags: <defaults>
</compile_context>

<pallas_src>
import functools

import jax
import jax.numpy as jnp
from jax.experimental import pallas as pl
from jax.experimental.pallas import tpu as pltpu


def lstm_fc_kernel(x_ref,       # (B*T, D)   bf16, batch-first flattened
                   wih0_ref,    # (D, 4H)    bf16
                   whh0_ref,    # (H, 4H)    bf16
                   b0_ref,      # (1, 4H)    f32   (b_ih0 + b_hh0)
                   w1_ref,      # (2H, 4H)   bf16  (concat [W_ih1; W_hh1])
                   b1_ref,      # (1, 4H)    f32   (b_ih1 + b_hh1)
                   wfc_ref,     # (H, O)     bf16
                   bfc_ref,     # (1, O)     f32
                   out_ref):    # (B, O)     f32
    B, _ = out_ref.shape
    H = whh0_ref.shape[0]
    BT, _ = x_ref.shape
    T = BT // B

    whh0 = whh0_ref[...]
    w1 = w1_ref[...]

    # Hoisted bias broadcast for layer 1 (done once, outside the loop).
    b1_b = jnp.broadcast_to(b1_ref[...], (B, 4 * H))

    # Hoisted input projection for layer 0: one big matmul over all timesteps,
    # bias folded in here as well.
    gx = jnp.dot(x_ref[...], wih0_ref[...],
                 preferred_element_type=jnp.float32)            # (B*T, 4H) f32
    gx = gx + jnp.broadcast_to(b0_ref[...], (BT, 4 * H))
    gx3 = gx.reshape(B, T, 4 * H)                               # tile-aligned split

    def gates_to_ifgo(gates):
        # Two full-width (128-lane) EUP activations, then slice gates out.
        sg = jax.nn.sigmoid(gates)
        th = jnp.tanh(gates)
        i = sg[:, 0:H]
        f = sg[:, H:2 * H]
        g = th[:, 2 * H:3 * H]
        o = sg[:, 3 * H:4 * H]
        return i, f, g, o

    h0 = jnp.zeros((B, H), jnp.float32)
    c0 = jnp.zeros((B, H), jnp.float32)
    h1 = jnp.zeros((B, H), jnp.float32)
    c1 = jnp.zeros((B, H), jnp.float32)

    # T is small and static -> fully unroll so adjacent steps can interleave.
    for t in range(T):
        # ---- layer 0: only the recurrent matmul remains on the critical path.
        g0 = gx3[:, t, :] + jnp.dot(h0.astype(jnp.bfloat16), whh0,
                                    preferred_element_type=jnp.float32)
        i0, f0, gg0, o0 = gates_to_ifgo(g0)
        c0 = f0 * c0 + i0 * gg0
        h0 = o0 * jnp.tanh(c0)

        # ---- layer 1: single fused matmul [h0, h1] @ [W_ih1; W_hh1].
        z = jnp.concatenate([h0, h1], axis=1).astype(jnp.bfloat16)   # (B, 2H)
        g1 = jnp.dot(z, w1, preferred_element_type=jnp.float32) + b1_b
        i1, f1, gg1, o1 = gates_to_ifgo(g1)
        c1 = f1 * c1 + i1 * gg1
        h1 = o1 * jnp.tanh(c1)

    # fc(hidden[-1])
    out = (jnp.dot(h1.astype(jnp.bfloat16), wfc_ref[...],
                   preferred_element_type=jnp.float32)
           + bfc_ref[...])
    out_ref[...] = out.astype(out_ref.dtype)


def init_params(key, input_dim, hidden_dim, output_dim):
    """Deterministic PyTorch-style init: U(-k, k), k = 1/sqrt(hidden_dim)."""
    k = 1.0 / jnp.sqrt(jnp.float32(hidden_dim))
    keys = jax.random.split(key, 10)

    def u(kk, shape):
        return jax.random.uniform(kk, shape, jnp.float32, -k, k)

    return {
        # layer 0
        "w_ih_l0": u(keys[0], (4 * hidden_dim, input_dim)),
        "w_hh_l0": u(keys[1], (4 * hidden_dim, hidden_dim)),
        "b_ih_l0": u(keys[2], (4 * hidden_dim,)),
        "b_hh_l0": u(keys[3], (4 * hidden_dim,)),
        # layer 1
        "w_ih_l1": u(keys[4], (4 * hidden_dim, hidden_dim)),
        "w_hh_l1": u(keys[5], (4 * hidden_dim, hidden_dim)),
        "b_ih_l1": u(keys[6], (4 * hidden_dim,)),
        "b_hh_l1": u(keys[7], (4 * hidden_dim,)),
        # fc (PyTorch Linear: k = 1/sqrt(in_features) = 1/sqrt(hidden_dim))
        "w_fc": u(keys[8], (output_dim, hidden_dim)),
        "b_fc": u(keys[9], (output_dim,)),
    }


@functools.partial(jax.jit, static_argnames=())
def lstm_model_forward(x, params):
    """x: (B, T, D) float32, batch_first like the PyTorch module."""
    B, T, D = x.shape
    H = params["w_hh_l0"].shape[1]
    O = params["w_fc"].shape[0]

    # Glue in plain JAX: flatten x batch-first (no transpose), pre-transpose
    # weights to (in, out), fuse the two LSTM biases, concat layer-1 weights,
    # and cast matmul operands to bf16 (f32 accumulation inside the kernel).
    x_flat = x.reshape(B * T, D).astype(jnp.bfloat16)                 # (B*T, D)
    wih0 = params["w_ih_l0"].T.astype(jnp.bfloat16)                   # (D, 4H)
    whh0 = params["w_hh_l0"].T.astype(jnp.bfloat16)                   # (H, 4H)
    b0 = (params["b_ih_l0"] + params["b_hh_l0"]).reshape(1, 4 * H)    # (1, 4H)
    w1 = jnp.concatenate([params["w_ih_l1"].T, params["w_hh_l1"].T],
                         axis=0).astype(jnp.bfloat16)                 # (2H, 4H)
    b1 = (params["b_ih_l1"] + params["b_hh_l1"]).reshape(1, 4 * H)    # (1, 4H)
    wfc = params["w_fc"].T.astype(jnp.bfloat16)                       # (H, O)
    bfc = params["b_fc"].reshape(1, O)                                # (1, O)

    args = (x_flat, wih0, whh0, b0, w1, b1, wfc, bfc)

    def full_spec(shape):
        n = len(shape)
        return pl.BlockSpec(shape, lambda i, _n=n: (0,) * _n)

    # TODO(synk): for large B on v7x, add a leading "parallel" grid axis over
    # batch tiles so both TensorCores run independent batch slices; at B=2 the
    # whole problem fits one core's VMEM trivially.
    return pl.pallas_call(
        lstm_fc_kernel,
        out_shape=jax.ShapeDtypeStruct((B, O), jnp.float32),
        grid=(1,),
        in_specs=[full_spec(a.shape) for a in args],
        out_specs=pl.BlockSpec((B, O), lambda i: (0, 0)),
        compiler_params=pltpu.CompilerParams(
            dimension_semantics=("arbitrary",)),
    )(*args)


if __name__ == "__main__":
    # Small shapes consistent with the module's forward pass.
    batch, seq, input_dim, hidden_dim, output_dim = 2, 8, 16, 32, 8

    key = jax.random.PRNGKey(0)
    k_x, k_p = jax.random.split(key)
    x = jax.random.normal(k_x, (batch, seq, input_dim), jnp.float32)
    params = init_params(k_p, input_dim, hidden_dim, output_dim)

    out = lstm_model_forward(x, params)
    out = jax.block_until_ready(out)
    assert out.shape == (batch, output_dim), out.shape
    assert bool(jnp.all(jnp.isfinite(out)))
    print("KERNEL_OK")
</pallas_src>

<mosaic_0001>
module attributes {stable_mosaic.version = 11 : i64} {
  func.func @lstm_fc_kernel(%arg0: i32, %arg1: memref<16x16xbf16, #tpu.memory_space<vmem>>, %arg2: memref<16x128xbf16, #tpu.memory_space<vmem>>, %arg3: memref<32x128xbf16, #tpu.memory_space<vmem>>, %arg4: memref<1x128xf32, #tpu.memory_space<vmem>>, %arg5: memref<64x128xbf16, #tpu.memory_space<vmem>>, %arg6: memref<1x128xf32, #tpu.memory_space<vmem>>, %arg7: memref<32x8xbf16, #tpu.memory_space<vmem>>, %arg8: memref<1x8xf32, #tpu.memory_space<vmem>>, %arg9: memref<2x8xf32, #tpu.memory_space<vmem>>) attributes {dimension_semantics = [#tpu.dimension_semantics<arbitrary>], iteration_bounds = array<i64: 1>, scalar_prefetch = 0 : i64, scratch_operands = 0 : i64, tpu.core_type = #tpu.core_type<tc>, window_params = [{pipeline_mode = #tpu.pipeline_mode<synchronous>, transform_indices = @transform_0, window_bounds = array<i64: 16, 16>}, {pipeline_mode = #tpu.pipeline_mode<synchronous>, transform_indices = @transform_1, window_bounds = array<i64: 16, 128>}, {pipeline_mode = #tpu.pipeline_mode<synchronous>, transform_indices = @transform_2, window_bounds = array<i64: 32, 128>}, {pipeline_mode = #tpu.pipeline_mode<synchronous>, transform_indices = @transform_3, window_bounds = array<i64: 1, 128>}, {pipeline_mode = #tpu.pipeline_mode<synchronous>, transform_indices = @transform_4, window_bounds = array<i64: 64, 128>}, {pipeline_mode = #tpu.pipeline_mode<synchronous>, transform_indices = @transform_5, window_bounds = array<i64: 1, 128>}, {pipeline_mode = #tpu.pipeline_mode<synchronous>, transform_indices = @transform_6, window_bounds = array<i64: 32, 8>}, {pipeline_mode = #tpu.pipeline_mode<synchronous>, transform_indices = @transform_7, window_bounds = array<i64: 1, 8>}, {pipeline_mode = #tpu.pipeline_mode<synchronous>, transform_indices = @transform_8, window_bounds = array<i64: 2, 8>}]} {
    %c0 = arith.constant 0 : index
    %c0_0 = arith.constant 0 : index
    %0 = vector.load %arg3[%c0, %c0_0] : memref<32x128xbf16, #tpu.memory_space<vmem>>, vector<32x128xbf16>
    %c0_1 = arith.constant 0 : index
    %c0_2 = arith.constant 0 : index
    %1 = vector.load %arg5[%c0_1, %c0_2] : memref<64x128xbf16, #tpu.memory_space<vmem>>, vector<64x128xbf16>
    %c0_3 = arith.constant 0 : index
    %c0_4 = arith.constant 0 : index
    %2 = vector.load %arg6[%c0_3, %c0_4] : memref<1x128xf32, #tpu.memory_space<vmem>>, vector<1x128xf32>
    %3 = vector.shape_cast %2 : vector<1x128xf32> to vector<1x128xf32>
    %4 = vector.broadcast %3 : vector<1x128xf32> to vector<2x128xf32>
    %c0_5 = arith.constant 0 : index
    %c0_6 = arith.constant 0 : index
    %5 = vector.load %arg1[%c0_5, %c0_6] : memref<16x16xbf16, #tpu.memory_space<vmem>>, vector<16x16xbf16>
    %c0_7 = arith.constant 0 : index
    %c0_8 = arith.constant 0 : index
    %6 = vector.load %arg2[%c0_7, %c0_8] : memref<16x128xbf16, #tpu.memory_space<vmem>>, vector<16x128xbf16>
    %cst = arith.constant dense<0.000000e+00> : vector<16x128xf32>
    %7 = tpu.matmul %5, %6, %cst {dimension_numbers = #tpu.dot_dimension_numbers<[1], [0], [0], [1], [0, 0, 1, 1], [], []>} : vector<16x16xbf16>, vector<16x128xbf16>, vector<16x128xf32> -> vector<16x128xf32>
    %c0_9 = arith.constant 0 : index
    %c0_10 = arith.constant 0 : index
    %8 = vector.load %arg4[%c0_9, %c0_10] : memref<1x128xf32, #tpu.memory_space<vmem>>, vector<1x128xf32>
    %9 = vector.shape_cast %8 : vector<1x128xf32> to vector<1x128xf32>
    %10 = vector.broadcast %9 : vector<1x128xf32> to vector<16x128xf32>
    %11 = arith.addf %7, %10 : vector<16x128xf32>
    %12 = vector.shape_cast %11 : vector<16x128xf32> to vector<2x8x128xf32>
    %cst_11 = arith.constant 0.000000e+00 : f32
    %13 = vector.broadcast %cst_11 : f32 to vector<2x32xf32>
    %cst_12 = arith.constant 0.000000e+00 : f32
    %14 = vector.broadcast %cst_12 : f32 to vector<2x32xf32>
    %cst_13 = arith.constant 0.000000e+00 : f32
    %15 = vector.broadcast %cst_13 : f32 to vector<2x32xf32>
    %cst_14 = arith.constant 0.000000e+00 : f32
    %16 = vector.broadcast %cst_14 : f32 to vector<2x32xf32>
    %17 = vector.extract_strided_slice %12 {offsets = [0, 0, 0], sizes = [2, 1, 128], strides = [1, 1, 1]} : vector<2x8x128xf32> to vector<2x1x128xf32>
    %18 = vector.shape_cast %17 : vector<2x1x128xf32> to vector<2x128xf32>
    %19 = arith.truncf %13 : vector<2x32xf32> to vector<2x32xbf16>
    %cst_15 = arith.constant dense<0.000000e+00> : vector<2x128xf32>
    %20 = tpu.matmul %19, %0, %cst_15 {dimension_numbers = #tpu.dot_dimension_numbers<[1], [0], [0], [1], [0, 0, 1, 1], [], []>} : vector<2x32xbf16>, vector<32x128xbf16>, vector<2x128xf32> -> vector<2x128xf32>
    %21 = arith.addf %18, %20 : vector<2x128xf32>
    %22 = arith.negf %21 : vector<2x128xf32>
    %23 = math.exp %22 : vector<2x128xf32>
    %cst_16 = arith.constant 1.000000e+00 : f32
    %24 = vector.broadcast %cst_16 : f32 to vector<2x128xf32>
    %25 = arith.addf %24, %23 : vector<2x128xf32>
    %26 = arith.divf %24, %25 : vector<2x128xf32>
    %27 = math.tanh %21 : vector<2x128xf32>
    %28 = vector.extract_strided_slice %26 {offsets = [0, 0], sizes = [2, 32], strides = [1, 1]} : vector<2x128xf32> to vector<2x32xf32>
    %29 = vector.extract_strided_slice %26 {offsets = [0, 32], sizes = [2, 32], strides = [1, 1]} : vector<2x128xf32> to vector<2x32xf32>
    %30 = vector.extract_strided_slice %27 {offsets = [0, 64], sizes = [2, 32], strides = [1, 1]} : vector<2x128xf32> to vector<2x32xf32>
    %31 = vector.extract_strided_slice %26 {offsets = [0, 96], sizes = [2, 32], strides = [1, 1]} : vector<2x128xf32> to vector<2x32xf32>
    %32 = arith.mulf %29, %14 : vector<2x32xf32>
    %33 = arith.mulf %28, %30 : vector<2x32xf32>
    %34 = arith.addf %32, %33 : vector<2x32xf32>
    %35 = math.tanh %34 : vector<2x32xf32>
    %36 = arith.mulf %31, %35 : vector<2x32xf32>
    %37 = tpu.concatenate %36, %15 in 1 : vector<2x32xf32>, vector<2x32xf32> -> vector<2x64xf32>
    %38 = arith.truncf %37 : vector<2x64xf32> to vector<2x64xbf16>
    %cst_17 = arith.constant dense<0.000000e+00> : vector<2x128xf32>
    %39 = tpu.matmul %38, %1, %cst_17 {dimension_numbers = #tpu.dot_dimension_numbers<[1], [0], [0], [1], [0, 0, 1, 1], [], []>} : vector<2x64xbf16>, vector<64x128xbf16>, vector<2x128xf32> -> vector<2x128xf32>
    %40 = arith.addf %39, %4 : vector<2x128xf32>
    %41 = arith.negf %40 : vector<2x128xf32>
    %42 = math.exp %41 : vector<2x128xf32>
    %cst_18 = arith.constant 1.000000e+00 : f32
    %43 = vector.broadcast %cst_18 : f32 to vector<2x128xf32>
    %44 = arith.addf %43, %42 : vector<2x128xf32>
    %45 = arith.divf %43, %44 : vector<2x128xf32>
    %46 = math.tanh %40 : vector<2x128xf32>
    %47 = vector.extract_strided_slice %45 {offsets = [0, 0], sizes = [2, 32], strides = [1, 1]} : vector<2x128xf32> to vector<2x32xf32>
    %48 = vector.extract_strided_slice %45 {offsets = [0, 32], sizes = [2, 32], strides = [1, 1]} : vector<2x128xf32> to vector<2x32xf32>
    %49 = vector.extract_strided_slice %46 {offsets = [0, 64], sizes = [2, 32], strides = [1, 1]} : vector<2x128xf32> to vector<2x32xf32>
    %50 = vector.extract_strided_slice %45 {offsets = [0, 96], sizes = [2, 32], strides = [1, 1]} : vector<2x128xf32> to vector<2x32xf32>
    %51 = arith.mulf %48, %16 : vector<2x32xf32>
    %52 = arith.mulf %47, %49 : vector<2x32xf32>
    %53 = arith.addf %51, %52 : vector<2x32xf32>
    %54 = math.tanh %53 : vector<2x32xf32>
    %55 = arith.mulf %50, %54 : vector<2x32xf32>
    %56 = vector.extract_strided_slice %12 {offsets = [0, 1, 0], sizes = [2, 1, 128], strides = [1, 1, 1]} : vector<2x8x128xf32> to vector<2x1x128xf32>
    %57 = vector.shape_cast %56 : vector<2x1x128xf32> to vector<2x128xf32>
    %58 = arith.truncf %36 : vector<2x32xf32> to vector<2x32xbf16>
    %cst_19 = arith.constant dense<0.000000e+00> : vector<2x128xf32>
    %59 = tpu.matmul %58, %0, %cst_19 {dimension_numbers = #tpu.dot_dimension_numbers<[1], [0], [0], [1], [0, 0, 1, 1], [], []>} : vector<2x32xbf16>, vector<32x128xbf16>, vector<2x128xf32> -> vector<2x128xf32>
    %60 = arith.addf %57, %59 : vector<2x128xf32>
    %61 = arith.negf %60 : vector<2x128xf32>
    %62 = math.exp %61 : vector<2x128xf32>
    %cst_20 = arith.constant 1.000000e+00 : f32
    %63 = vector.broadcast %cst_20 : f32 to vector<2x128xf32>
    %64 = arith.addf %63, %62 : vector<2x128xf32>
    %65 = arith.divf %63, %64 : vector<2x128xf32>
    %66 = math.tanh %60 : vector<2x128xf32>
    %67 = vector.extract_strided_slice %65 {offsets = [0, 0], sizes = [2, 32], strides = [1, 1]} : vector<2x128xf32> to vector<2x32xf32>
    %68 = vector.extract_strided_slice %65 {offsets = [0, 32], sizes = [2, 32], strides = [1, 1]} : vector<2x128xf32> to vector<2x32xf32>
    %69 = vector.extract_strided_slice %66 {offsets = [0, 64], sizes = [2, 32], strides = [1, 1]} : vector<2x128xf32> to vector<2x32xf32>
    %70 = vector.extract_strided_slice %65 {offsets = [0, 96], sizes = [2, 32], strides = [1, 1]} : vector<2x128xf32> to vector<2x32xf32>
    %71 = arith.mulf %68, %34 : vector<2x32xf32>
    %72 = arith.mulf %67, %69 : vector<2x32xf32>
    %73 = arith.addf %71, %72 : vector<2x32xf32>
    %74 = math.tanh %73 : vector<2x32xf32>
    %75 = arith.mulf %70, %74 : vector<2x32xf32>
    %76 = tpu.concatenate %75, %55 in 1 : vector<2x32xf32>, vector<2x32xf32> -> vector<2x64xf32>
    %77 = arith.truncf %76 : vector<2x64xf32> to vector<2x64xbf16>
    %cst_21 = arith.constant dense<0.000000e+00> : vector<2x128xf32>
    %78 = tpu.matmul %77, %1, %cst_21 {dimension_numbers = #tpu.dot_dimension_numbers<[1], [0], [0], [1], [0, 0, 1, 1], [], []>} : vector<2x64xbf16>, vector<64x128xbf16>, vector<2x128xf32> -> vector<2x128xf32>
    %79 = arith.addf %78, %4 : vector<2x128xf32>
    %80 = arith.negf %79 : vector<2x128xf32>
    %81 = math.exp %80 : vector<2x128xf32>
    %cst_22 = arith.constant 1.000000e+00 : f32
    %82 = vector.broadcast %cst_22 : f32 to vector<2x128xf32>
    %83 = arith.addf %82, %81 : vector<2x128xf32>
    %84 = arith.divf %82, %83 : vector<2x128xf32>
    %85 = math.tanh %79 : vector<2x128xf32>
    %86 = vector.extract_strided_slice %84 {offsets = [0, 0], sizes = [2, 32], strides = [1, 1]} : vector<2x128xf32> to vector<2x32xf32>
    %87 = vector.extract_strided_slice %84 {offsets = [0, 32], sizes = [2, 32], strides = [1, 1]} : vector<2x128xf32> to vector<2x32xf32>
    %88 = vector.extract_strided_slice %85 {offsets = [0, 64], sizes = [2, 32], strides = [1, 1]} : vector<2x128xf32> to vector<2x32xf32>
    %89 = vector.extract_strided_slice %84 {offsets = [0, 96], sizes = [2, 32], strides = [1, 1]} : vector<2x128xf32> to vector<2x32xf32>
    %90 = arith.mulf %87, %53 : vector<2x32xf32>
    %91 = arith.mulf %86, %88 : vector<2x32xf32>
    %92 = arith.addf %90, %91 : vector<2x32xf32>
    %93 = math.tanh %92 : vector<2x32xf32>
    %94 = arith.mulf %89, %93 : vector<2x32xf32>
    %95 = vector.extract_strided_slice %12 {offsets = [0, 2, 0], sizes = [2, 1, 128], strides = [1, 1, 1]} : vector<2x8x128xf32> to vector<2x1x128xf32>
    %96 = vector.shape_cast %95 : vector<2x1x128xf32> to vector<2x128xf32>
    %97 = arith.truncf %75 : vector<2x32xf32> to vector<2x32xbf16>
    %cst_23 = arith.constant dense<0.000000e+00> : vector<2x128xf32>
    %98 = tpu.matmul %97, %0, %cst_23 {dimension_numbers = #tpu.dot_dimension_numbers<[1], [0], [0], [1], [0, 0, 1, 1], [], []>} : vector<2x32xbf16>, vector<32x128xbf16>, vector<2x128xf32> -> vector<2x128xf32>
    %99 = arith.addf %96, %98 : vector<2x128xf32>
    %100 = arith.negf %99 : vector<2x128xf32>
    %101 = math.exp %100 : vector<2x128xf32>
    %cst_24 = arith.constant 1.000000e+00 : f32
    %102 = vector.broadcast %cst_24 : f32 to vector<2x128xf32>
    %103 = arith.addf %102, %101 : vector<2x128xf32>
    %104 = arith.divf %102, %103 : vector<2x128xf32>
    %105 = math.tanh %99 : vector<2x128xf32>
    %106 = vector.extract_strided_slice %104 {offsets = [0, 0], sizes = [2, 32], strides = [1, 1]} : vector<2x128xf32> to vector<2x32xf32>
    %107 = vector.extract_strided_slice %104 {offsets = [0, 32], sizes = [2, 32], strides = [1, 1]} : vector<2x128xf32> to vector<2x32xf32>
    %108 = vector.extract_strided_slice %105 {offsets = [0, 64], sizes = [2, 32], strides = [1, 1]} : vector<2x128xf32> to vector<2x32xf32>
    %109 = vector.extract_strided_slice %104 {offsets = [0, 96], sizes = [2, 32], strides = [1, 1]} : vector<2x128xf32> to vector<2x32xf32>
    %110 = arith.mulf %107, %73 : vector<2x32xf32>
    %111 = arith.mulf %106, %108 : vector<2x32xf32>
    %112 = arith.addf %110, %111 : vector<2x32xf32>
    %113 = math.tanh %112 : vector<2x32xf32>
    %114 = arith.mulf %109, %113 : vector<2x32xf32>
    %115 = tpu.concatenate %114, %94 in 1 : vector<2x32xf32>, vector<2x32xf32> -> vector<2x64xf32>
    %116 = arith.truncf %115 : vector<2x64xf32> to vector<2x64xbf16>
    %cst_25 = arith.constant dense<0.000000e+00> : vector<2x128xf32>
    %117 = tpu.matmul %116, %1, %cst_25 {dimension_numbers = #tpu.dot_dimension_numbers<[1], [0], [0], [1], [0, 0, 1, 1], [], []>} : vector<2x64xbf16>, vector<64x128xbf16>, vector<2x128xf32> -> vector<2x128xf32>
    %118 = arith.addf %117, %4 : vector<2x128xf32>
    %119 = arith.negf %118 : vector<2x128xf32>
    %120 = math.exp %119 : vector<2x128xf32>
    %cst_26 = arith.constant 1.000000e+00 : f32
    %121 = vector.broadcast %cst_26 : f32 to vector<2x128xf32>
    %122 = arith.addf %121, %120 : vector<2x128xf32>
    %123 = arith.divf %121, %122 : vector<2x128xf32>
    %124 = math.tanh %118 : vector<2x128xf32>
    %125 = vector.extract_strided_slice %123 {offsets = [0, 0], sizes = [2, 32], strides = [1, 1]} : vector<2x128xf32> to vector<2x32xf32>
    %126 = vector.extract_strided_slice %123 {offsets = [0, 32], sizes = [2, 32], strides = [1, 1]} : vector<2x128xf32> to vector<2x32xf32>
    %127 = vector.extract_strided_slice %124 {offsets = [0, 64], sizes = [2, 32], strides = [1, 1]} : vector<2x128xf32> to vector<2x32xf32>
    %128 = vector.extract_strided_slice %123 {offsets = [0, 96], sizes = [2, 32], strides = [1, 1]} : vector<2x128xf32> to vector<2x32xf32>
    %129 = arith.mulf %126, %92 : vector<2x32xf32>
    %130 = arith.mulf %125, %127 : vector<2x32xf32>
    %131 = arith.addf %129, %130 : vector<2x32xf32>
    %132 = math.tanh %131 : vector<2x32xf32>
    %133 = arith.mulf %128, %132 : vector<2x32xf32>
    %134 = vector.extract_strided_slice %12 {offsets = [0, 3, 0], sizes = [2, 1, 128], strides = [1, 1, 1]} : vector<2x8x128xf32> to vector<2x1x128xf32>
    %135 = vector.shape_cast %134 : vector<2x1x128xf32> to vector<2x128xf32>
    %136 = arith.truncf %114 : vector<2x32xf32> to vector<2x32xbf16>
    %cst_27 = arith.constant dense<0.000000e+00> : vector<2x128xf32>
    %137 = tpu.matmul %136, %0, %cst_27 {dimension_numbers = #tpu.dot_dimension_numbers<[1], [0], [0], [1], [0, 0, 1, 1], [], []>} : vector<2x32xbf16>, vector<32x128xbf16>, vector<2x128xf32> -> vector<2x128xf32>
    %138 = arith.addf %135, %137 : vector<2x128xf32>
    %139 = arith.negf %138 : vector<2x128xf32>
    %140 = math.exp %139 : vector<2x128xf32>
    %cst_28 = arith.constant 1.000000e+00 : f32
    %141 = vector.broadcast %cst_28 : f32 to vector<2x128xf32>
    %142 = arith.addf %141, %140 : vector<2x128xf32>
    %143 = arith.divf %141, %142 : vector<2x128xf32>
    %144 = math.tanh %138 : vector<2x128xf32>
    %145 = vector.extract_strided_slice %143 {offsets = [0, 0], sizes = [2, 32], strides = [1, 1]} : vector<2x128xf32> to vector<2x32xf32>
    %146 = vector.extract_strided_slice %143 {offsets = [0, 32], sizes = [2, 32], strides = [1, 1]} : vector<2x128xf32> to vector<2x32xf32>
    %147 = vector.extract_strided_slice %144 {offsets = [0, 64], sizes = [2, 32], strides = [1, 1]} : vector<2x128xf32> to vector<2x32xf32>
    %148 = vector.extract_strided_slice %143 {offsets = [0, 96], sizes = [2, 32], strides = [1, 1]} : vector<2x128xf32> to vector<2x32xf32>
    %149 = arith.mulf %146, %112 : vector<2x32xf32>
    %150 = arith.mulf %145, %147 : vector<2x32xf32>
    %151 = arith.addf %149, %150 : vector<2x32xf32>
    %152 = math.tanh %151 : vector<2x32xf32>
    %153 = arith.mulf %148, %152 : vector<2x32xf32>
    %154 = tpu.concatenate %153, %133 in 1 : vector<2x32xf32>, vector<2x32xf32> -> vector<2x64xf32>
    %155 = arith.truncf %154 : vector<2x64xf32> to vector<2x64xbf16>
    %cst_29 = arith.constant dense<0.000000e+00> : vector<2x128xf32>
    %156 = tpu.matmul %155, %1, %cst_29 {dimension_numbers = #tpu.dot_dimension_numbers<[1], [0], [0], [1], [0, 0, 1, 1], [], []>} : vector<2x64xbf16>, vector<64x128xbf16>, vector<2x128xf32> -> vector<2x128xf32>
    %157 = arith.addf %156, %4 : vector<2x128xf32>
    %158 = arith.negf %157 : vector<2x128xf32>
    %159 = math.exp %158 : vector<2x128xf32>
    %cst_30 = arith.constant 1.000000e+00 : f32
    %160 = vector.broadcast %cst_30 : f32 to vector<2x128xf32>
    %161 = arith.addf %160, %159 : vector<2x128xf32>
    %162 = arith.divf %160, %161 : vector<2x128xf32>
    %163 = math.tanh %157 : vector<2x128xf32>
    %164 = vector.extract_strided_slice %162 {offsets = [0, 0], sizes = [2, 32], strides = [1, 1]} : vector<2x128xf32> to vector<2x32xf32>
    %165 = vector.extract_strided_slice %162 {offsets = [0, 32], sizes = [2, 32], strides = [1, 1]} : vector<2x128xf32> to vector<2x32xf32>
    %166 = vector.extract_strided_slice %163 {offsets = [0, 64], sizes = [2, 32], strides = [1, 1]} : vector<2x128xf32> to vector<2x32xf32>
    %167 = vector.extract_strided_slice %162 {offsets = [0, 96], sizes = [2, 32], strides = [1, 1]} : vector<2x128xf32> to vector<2x32xf32>
    %168 = arith.mulf %165, %131 : vector<2x32xf32>
    %169 = arith.mulf %164, %166 : vector<2x32xf32>
    %170 = arith.addf %168, %169 : vector<2x32xf32>
    %171 = math.tanh %170 : vector<2x32xf32>
    %172 = arith.mulf %167, %171 : vector<2x32xf32>
    %173 = vector.extract_strided_slice %12 {offsets = [0, 4, 0], sizes = [2, 1, 128], strides = [1, 1, 1]} : vector<2x8x128xf32> to vector<2x1x128xf32>
    %174 = vector.shape_cast %173 : vector<2x1x128xf32> to vector<2x128xf32>
    %175 = arith.truncf %153 : vector<2x32xf32> to vector<2x32xbf16>
    %cst_31 = arith.constant dense<0.000000e+00> : vector<2x128xf32>
    %176 = tpu.matmul %175, %0, %cst_31 {dimension_numbers = #tpu.dot_dimension_numbers<[1], [0], [0], [1], [0, 0, 1, 1], [], []>} : vector<2x32xbf16>, vector<32x128xbf16>, vector<2x128xf32> -> vector<2x128xf32>
    %177 = arith.addf %174, %176 : vector<2x128xf32>
    %178 = arith.negf %177 : vector<2x128xf32>
    %179 = math.exp %178 : vector<2x128xf32>
    %cst_32 = arith.constant 1.000000e+00 : f32
    %180 = vector.broadcast %cst_32 : f32 to vector<2x128xf32>
    %181 = arith.addf %180, %179 : vector<2x128xf32>
    %182 = arith.divf %180, %181 : vector<2x128xf32>
    %183 = math.tanh %177 : vector<2x128xf32>
    %184 = vector.extract_strided_slice %182 {offsets = [0, 0], sizes = [2, 32], strides = [1, 1]} : vector<2x128xf32> to vector<2x32xf32>
    %185 = vector.extract_strided_slice %182 {offsets = [0, 32], sizes = [2, 32], strides = [1, 1]} : vector<2x128xf32> to vector<2x32xf32>
    %186 = vector.extract_strided_slice %183 {offsets = [0, 64], sizes = [2, 32], strides = [1, 1]} : vector<2x128xf32> to vector<2x32xf32>
    %187 = vector.extract_strided_slice %182 {offsets = [0, 96], sizes = [2, 32], strides = [1, 1]} : vector<2x128xf32> to vector<2x32xf32>
    %188 = arith.mulf %185, %151 : vector<2x32xf32>
    %189 = arith.mulf %184, %186 : vector<2x32xf32>
    %190 = arith.addf %188, %189 : vector<2x32xf32>
    %191 = math.tanh %190 : vector<2x32xf32>
    %192 = arith.mulf %187, %191 : vector<2x32xf32>
    %193 = tpu.concatenate %192, %172 in 1 : vector<2x32xf32>, vector<2x32xf32> -> vector<2x64xf32>
    %194 = arith.truncf %193 : vector<2x64xf32> to vector<2x64xbf16>
    %cst_33 = arith.constant dense<0.000000e+00> : vector<2x128xf32>
    %195 = tpu.matmul %194, %1, %cst_33 {dimension_numbers = #tpu.dot_dimension_numbers<[1], [0], [0], [1], [0, 0, 1, 1], [], []>} : vector<2x64xbf16>, vector<64x128xbf16>, vector<2x128xf32> -> vector<2x128xf32>
    %196 = arith.addf %195, %4 : vector<2x128xf32>
    %197 = arith.negf %196 : vector<2x128xf32>
    %198 = math.exp %197 : vector<2x128xf32>
    %cst_34 = arith.constant 1.000000e+00 : f32
    %199 = vector.broadcast %cst_34 : f32 to vector<2x128xf32>
    %200 = arith.addf %199, %198 : vector<2x128xf32>
    %201 = arith.divf %199, %200 : vector<2x128xf32>
    %202 = math.tanh %196 : vector<2x128xf32>
    %203 = vector.extract_strided_slice %201 {offsets = [0, 0], sizes = [2, 32], strides = [1, 1]} : vector<2x128xf32> to vector<2x32xf32>
    %204 = vector.extract_strided_slice %201 {offsets = [0, 32], sizes = [2, 32], strides = [1, 1]} : vector<2x128xf32> to vector<2x32xf32>
    %205 = vector.extract_strided_slice %202 {offsets = [0, 64], sizes = [2, 32], strides = [1, 1]} : vector<2x128xf32> to vector<2x32xf32>
    %206 = vector.extract_strided_slice %201 {offsets = [0, 96], sizes = [2, 32], strides = [1, 1]} : vector<2x128xf32> to vector<2x32xf32>
    %207 = arith.mulf %204, %170 : vector<2x32xf32>
    %208 = arith.mulf %203, %205 : vector<2x32xf32>
    %209 = arith.addf %207, %208 : vector<2x32xf32>
    %210 = math.tanh %209 : vector<2x32xf32>
    %211 = arith.mulf %206, %210 : vector<2x32xf32>
    %212 = vector.extract_strided_slice %12 {offsets = [0, 5, 0], sizes = [2, 1, 128], strides = [1, 1, 1]} : vector<2x8x128xf32> to vector<2x1x128xf32>
    %213 = vector.shape_cast %212 : vector<2x1x128xf32> to vector<2x128xf32>
    %214 = arith.truncf %192 : vector<2x32xf32> to vector<2x32xbf16>
    %cst_35 = arith.constant dense<0.000000e+00> : vector<2x128xf32>
    %215 = tpu.matmul %214, %0, %cst_35 {dimension_numbers = #tpu.dot_dimension_numbers<[1], [0], [0], [1], [0, 0, 1, 1], [], []>} : vector<2x32xbf16>, vector<32x128xbf16>, vector<2x128xf32> -> vector<2x128xf32>
    %216 = arith.addf %213, %215 : vector<2x128xf32>
    %217 = arith.negf %216 : vector<2x128xf32>
    %218 = math.exp %217 : vector<2x128xf32>
    %cst_36 = arith.constant 1.000000e+00 : f32
    %219 = vector.broadcast %cst_36 : f32 to vector<2x128xf32>
    %220 = arith.addf %219, %218 : vector<2x128xf32>
    %221 = arith.divf %219, %220 : vector<2x128xf32>
    %222 = math.tanh %216 : vector<2x128xf32>
    %223 = vector.extract_strided_slice %221 {offsets = [0, 0], sizes = [2, 32], strides = [1, 1]} : vector<2x128xf32> to vector<2x32xf32>
    %224 = vector.extract_strided_slice %221 {offsets = [0, 32], sizes = [2, 32], strides = [1, 1]} : vector<2x128xf32> to vector<2x32xf32>
    %225 = vector.extract_strided_slice %222 {offsets = [0, 64], sizes = [2, 32], strides = [1, 1]} : vector<2x128xf32> to vector<2x32xf32>
    %226 = vector.extract_strided_slice %221 {offsets = [0, 96], sizes = [2, 32], strides = [1, 1]} : vector<2x128xf32> to vector<2x32xf32>
    %227 = arith.mulf %224, %190 : vector<2x32xf32>
    %228 = arith.mulf %223, %225 : vector<2x32xf32>
    %229 = arith.addf %227, %228 : vector<2x32xf32>
    %230 = math.tanh %229 : vector<2x32xf32>
    %231 = arith.mulf %226, %230 : vector<2x32xf32>
    %232 = tpu.concatenate %231, %211 in 1 : vector<2x32xf32>, vector<2x32xf32> -> vector<2x64xf32>
    %233 = arith.truncf %232 : vector<2x64xf32> to vector<2x64xbf16>
    %cst_37 = arith.constant dense<0.000000e+00> : vector<2x128xf32>
    %234 = tpu.matmul %233, %1, %cst_37 {dimension_numbers = #tpu.dot_dimension_numbers<[1], [0], [0], [1], [0, 0, 1, 1], [], []>} : vector<2x64xbf16>, vector<64x128xbf16>, vector<2x128xf32> -> vector<2x128xf32>
    %235 = arith.addf %234, %4 : vector<2x128xf32>
    %236 = arith.negf %235 : vector<2x128xf32>
    %237 = math.exp %236 : vector<2x128xf32>
    %cst_38 = arith.constant 1.000000e+00 : f32
    %238 = vector.broadcast %cst_38 : f32 to vector<2x128xf32>
    %239 = arith.addf %238, %237 : vector<2x128xf32>
    %240 = arith.divf %238, %239 : vector<2x128xf32>
    %241 = math.tanh %235 : vector<2x128xf32>
    %242 = vector.extract_strided_slice %240 {offsets = [0, 0], sizes = [2, 32], strides = [1, 1]} : vector<2x128xf32> to vector<2x32xf32>
    %243 = vector.extract_strided_slice %240 {offsets = [0, 32], sizes = [2, 32], strides = [1, 1]} : vector<2x128xf32> to vector<2x32xf32>
    %244 = vector.extract_strided_slice %241 {offsets = [0, 64], sizes = [2, 32], strides = [1, 1]} : vector<2x128xf32> to vector<2x32xf32>
    %245 = vector.extract_strided_slice %240 {offsets = [0, 96], sizes = [2, 32], strides = [1, 1]} : vector<2x128xf32> to vector<2x32xf32>
    %246 = arith.mulf %243, %209 : vector<2x32xf32>
    %247 = arith.mulf %242, %244 : vector<2x32xf32>
    %248 = arith.addf %246, %247 : vector<2x32xf32>
    %249 = math.tanh %248 : vector<2x32xf32>
    %250 = arith.mulf %245, %249 : vector<2x32xf32>
    %251 = vector.extract_strided_slice %12 {offsets = [0, 6, 0], sizes = [2, 1, 128], strides = [1, 1, 1]} : vector<2x8x128xf32> to vector<2x1x128xf32>
    %252 = vector.shape_cast %251 : vector<2x1x128xf32> to vector<2x128xf32>
    %253 = arith.truncf %231 : vector<2x32xf32> to vector<2x32xbf16>
    %cst_39 = arith.constant dense<0.000000e+00> : vector<2x128xf32>
    %254 = tpu.matmul %253, %0, %cst_39 {dimension_numbers = #tpu.dot_dimension_numbers<[1], [0], [0], [1], [0, 0, 1, 1], [], []>} : vector<2x32xbf16>, vector<32x128xbf16>, vector<2x128xf32> -> vector<2x128xf32>
    %255 = arith.addf %252, %254 : vector<2x128xf32>
    %256 = arith.negf %255 : vector<2x128xf32>
    %257 = math.exp %256 : vector<2x128xf32>
    %cst_40 = arith.constant 1.000000e+00 : f32
    %258 = vector.broadcast %cst_40 : f32 to vector<2x128xf32>
    %259 = arith.addf %258, %257 : vector<2x128xf32>
    %260 = arith.divf %258, %259 : vector<2x128xf32>
    %261 = math.tanh %255 : vector<2x128xf32>
    %262 = vector.extract_strided_slice %260 {offsets = [0, 0], sizes = [2, 32], strides = [1, 1]} : vector<2x128xf32> to vector<2x32xf32>
    %263 = vector.extract_strided_slice %260 {offsets = [0, 32], sizes = [2, 32], strides = [1, 1]} : vector<2x128xf32> to vector<2x32xf32>
    %264 = vector.extract_strided_slice %261 {offsets = [0, 64], sizes = [2, 32], strides = [1, 1]} : vector<2x128xf32> to vector<2x32xf32>
    %265 = vector.extract_strided_slice %260 {offsets = [0, 96], sizes = [2, 32], strides = [1, 1]} : vector<2x128xf32> to vector<2x32xf32>
    %266 = arith.mulf %263, %229 : vector<2x32xf32>
    %267 = arith.mulf %262, %264 : vector<2x32xf32>
    %268 = arith.addf %266, %267 : vector<2x32xf32>
    %269 = math.tanh %268 : vector<2x32xf32>
    %270 = arith.mulf %265, %269 : vector<2x32xf32>
    %271 = tpu.concatenate %270, %250 in 1 : vector<2x32xf32>, vector<2x32xf32> -> vector<2x64xf32>
    %272 = arith.truncf %271 : vector<2x64xf32> to vector<2x64xbf16>
    %cst_41 = arith.constant dense<0.000000e+00> : vector<2x128xf32>
    %273 = tpu.matmul %272, %1, %cst_41 {dimension_numbers = #tpu.dot_dimension_numbers<[1], [0], [0], [1], [0, 0, 1, 1], [], []>} : vector<2x64xbf16>, vector<64x128xbf16>, vector<2x128xf32> -> vector<2x128xf32>
    %274 = arith.addf %273, %4 : vector<2x128xf32>
    %275 = arith.negf %274 : vector<2x128xf32>
    %276 = math.exp %275 : vector<2x128xf32>
    %cst_42 = arith.constant 1.000000e+00 : f32
    %277 = vector.broadcast %cst_42 : f32 to vector<2x128xf32>
    %278 = arith.addf %277, %276 : vector<2x128xf32>
    %279 = arith.divf %277, %278 : vector<2x128xf32>
    %280 = math.tanh %274 : vector<2x128xf32>
    %281 = vector.extract_strided_slice %279 {offsets = [0, 0], sizes = [2, 32], strides = [1, 1]} : vector<2x128xf32> to vector<2x32xf32>
    %282 = vector.extract_strided_slice %279 {offsets = [0, 32], sizes = [2, 32], strides = [1, 1]} : vector<2x128xf32> to vector<2x32xf32>
    %283 = vector.extract_strided_slice %280 {offsets = [0, 64], sizes = [2, 32], strides = [1, 1]} : vector<2x128xf32> to vector<2x32xf32>
    %284 = vector.extract_strided_slice %279 {offsets = [0, 96], sizes = [2, 32], strides = [1, 1]} : vector<2x128xf32> to vector<2x32xf32>
    %285 = arith.mulf %282, %248 : vector<2x32xf32>
    %286 = arith.mulf %281, %283 : vector<2x32xf32>
    %287 = arith.addf %285, %286 : vector<2x32xf32>
    %288 = math.tanh %287 : vector<2x32xf32>
    %289 = arith.mulf %284, %288 : vector<2x32xf32>
    %290 = vector.extract_strided_slice %12 {offsets = [0, 7, 0], sizes = [2, 1, 128], strides = [1, 1, 1]} : vector<2x8x128xf32> to vector<2x1x128xf32>
    %291 = vector.shape_cast %290 : vector<2x1x128xf32> to vector<2x128xf32>
    %292 = arith.truncf %270 : vector<2x32xf32> to vector<2x32xbf16>
    %cst_43 = arith.constant dense<0.000000e+00> : vector<2x128xf32>
    %293 = tpu.matmul %292, %0, %cst_43 {dimension_numbers = #tpu.dot_dimension_numbers<[1], [0], [0], [1], [0, 0, 1, 1], [], []>} : vector<2x32xbf16>, vector<32x128xbf16>, vector<2x128xf32> -> vector<2x128xf32>
    %294 = arith.addf %291, %293 : vector<2x128xf32>
    %295 = arith.negf %294 : vector<2x128xf32>
    %296 = math.exp %295 : vector<2x128xf32>
    %cst_44 = arith.constant 1.000000e+00 : f32
    %297 = vector.broadcast %cst_44 : f32 to vector<2x128xf32>
    %298 = arith.addf %297, %296 : vector<2x128xf32>
    %299 = arith.divf %297, %298 : vector<2x128xf32>
    %300 = math.tanh %294 : vector<2x128xf32>
    %301 = vector.extract_strided_slice %299 {offsets = [0, 0], sizes = [2, 32], strides = [1, 1]} : vector<2x128xf32> to vector<2x32xf32>
    %302 = vector.extract_strided_slice %299 {offsets = [0, 32], sizes = [2, 32], strides = [1, 1]} : vector<2x128xf32> to vector<2x32xf32>
    %303 = vector.extract_strided_slice %300 {offsets = [0, 64], sizes = [2, 32], strides = [1, 1]} : vector<2x128xf32> to vector<2x32xf32>
    %304 = vector.extract_strided_slice %299 {offsets = [0, 96], sizes = [2, 32], strides = [1, 1]} : vector<2x128xf32> to vector<2x32xf32>
    %305 = arith.mulf %302, %268 : vector<2x32xf32>
    %306 = arith.mulf %301, %303 : vector<2x32xf32>
    %307 = arith.addf %305, %306 : vector<2x32xf32>
    %308 = math.tanh %307 : vector<2x32xf32>
    %309 = arith.mulf %304, %308 : vector<2x32xf32>
    %310 = tpu.concatenate %309, %289 in 1 : vector<2x32xf32>, vector<2x32xf32> -> vector<2x64xf32>
    %311 = arith.truncf %310 : vector<2x64xf32> to vector<2x64xbf16>
    %cst_45 = arith.constant dense<0.000000e+00> : vector<2x128xf32>
    %312 = tpu.matmul %311, %1, %cst_45 {dimension_numbers = #tpu.dot_dimension_numbers<[1], [0], [0], [1], [0, 0, 1, 1], [], []>} : vector<2x64xbf16>, vector<64x128xbf16>, vector<2x128xf32> -> vector<2x128xf32>
    %313 = arith.addf %312, %4 : vector<2x128xf32>
    %314 = arith.negf %313 : vector<2x128xf32>
    %315 = math.exp %314 : vector<2x128xf32>
    %cst_46 = arith.constant 1.000000e+00 : f32
    %316 = vector.broadcast %cst_46 : f32 to vector<2x128xf32>
    %317 = arith.addf %316, %315 : vector<2x128xf32>
    %318 = arith.divf %316, %317 : vector<2x128xf32>
    %319 = math.tanh %313 : vector<2x128xf32>
    %320 = vector.extract_strided_slice %318 {offsets = [0, 0], sizes = [2, 32], strides = [1, 1]} : vector<2x128xf32> to vector<2x32xf32>
    %321 = vector.extract_strided_slice %318 {offsets = [0, 32], sizes = [2, 32], strides = [1, 1]} : vector<2x128xf32> to vector<2x32xf32>
    %322 = vector.extract_strided_slice %319 {offsets = [0, 64], sizes = [2, 32], strides = [1, 1]} : vector<2x128xf32> to vector<2x32xf32>
    %323 = vector.extract_strided_slice %318 {offsets = [0, 96], sizes = [2, 32], strides = [1, 1]} : vector<2x128xf32> to vector<2x32xf32>
    %324 = arith.mulf %321, %287 : vector<2x32xf32>
    %325 = arith.mulf %320, %322 : vector<2x32xf32>
    %326 = arith.addf %324, %325 : vector<2x32xf32>
    %327 = math.tanh %326 : vector<2x32xf32>
    %328 = arith.mulf %323, %327 : vector<2x32xf32>
    %329 = arith.truncf %328 : vector<2x32xf32> to vector<2x32xbf16>
    %c0_47 = arith.constant 0 : index
    %c0_48 = arith.constant 0 : index
    %330 = vector.load %arg7[%c0_47, %c0_48] : memref<32x8xbf16, #tpu.memory_space<vmem>>, vector<32x8xbf16>
    %cst_49 = arith.constant dense<0.000000e+00> : vector<2x8xf32>
    %331 = tpu.matmul %329, %330, %cst_49 {dimension_numbers = #tpu.dot_dimension_numbers<[1], [0], [0], [1], [0, 0, 1, 1], [], []>} : vector<2x32xbf16>, vector<32x8xbf16>, vector<2x8xf32> -> vector<2x8xf32>
    %c0_50 = arith.constant 0 : index
    %c0_51 = arith.constant 0 : index
    %332 = vector.load %arg8[%c0_50, %c0_51] : memref<1x8xf32, #tpu.memory_space<vmem>>, vector<1x8xf32>
    %333 = vector.broadcast %332 : vector<1x8xf32> to vector<2x8xf32>
    %334 = arith.addf %331, %333 : vector<2x8xf32>
    %c0_52 = arith.constant 0 : index
    %c0_53 = arith.constant 0 : index
    %335 = vector.load %arg9[%c0_52, %c0_53] : memref<2x8xf32, #tpu.memory_space<vmem>>, vector<2x8xf32>
    tpu.vector_store %arg9[%c0_52, %c0_53], %334 {strides = array<i32>} : memref<2x8xf32, #tpu.memory_space<vmem>>, vector<2x8xf32>,
    return
  }
  func.func @transform_0(%arg0: i32) -> (i32, i32) {
    %c0_i32 = arith.constant 0 : i32
    %c0_i32_0 = arith.constant 0 : i32
    %c0_i32_1 = arith.constant 0 : i32
    return %c0_i32, %c0_i32_0 : i32, i32
  }
  func.func @transform_1(%arg0: i32) -> (i32, i32) {
    %c0_i32 = arith.constant 0 : i32
    %c0_i32_0 = arith.constant 0 : i32
    %c0_i32_1 = arith.constant 0 : i32
    return %c0_i32, %c0_i32_0 : i32, i32
  }
  func.func @transform_2(%arg0: i32) -> (i32, i32) {
    %c0_i32 = arith.constant 0 : i32
    %c0_i32_0 = arith.constant 0 : i32
    %c0_i32_1 = arith.constant 0 : i32
    return %c0_i32, %c0_i32_0 : i32, i32
  }
  func.func @transform_3(%arg0: i32) -> (i32, i32) {
    %c0_i32 = arith.constant 0 : i32
    %c0_i32_0 = arith.constant 0 : i32
    %c0_i32_1 = arith.constant 0 : i32
    return %c0_i32, %c0_i32_0 : i32, i32
  }
  func.func @transform_4(%arg0: i32) -> (i32, i32) {
    %c0_i32 = arith.constant 0 : i32
    %c0_i32_0 = arith.constant 0 : i32
    %c0_i32_1 = arith.constant 0 : i32
    return %c0_i32, %c0_i32_0 : i32, i32
  }
  func.func @transform_5(%arg0: i32) -> (i32, i32) {
    %c0_i32 = arith.constant 0 : i32
    %c0_i32_0 = arith.constant 0 : i32
    %c0_i32_1 = arith.constant 0 : i32
    return %c0_i32, %c0_i32_0 : i32, i32
  }
  func.func @transform_6(%arg0: i32) -> (i32, i32) {
    %c0_i32 = arith.constant 0 : i32
    %c0_i32_0 = arith.constant 0 : i32
    %c0_i32_1 = arith.constant 0 : i32
    return %c0_i32, %c0_i32_0 : i32, i32
  }
  func.func @transform_7(%arg0: i32) -> (i32, i32) {
    %c0_i32 = arith.constant 0 : i32
    %c0_i32_0 = arith.constant 0 : i32
    %c0_i32_1 = arith.constant 0 : i32
    return %c0_i32, %c0_i32_0 : i32, i32
  }
  func.func @transform_8(%arg0: i32) -> (i32, i32) {
    %c0_i32 = arith.constant 0 : i32
    %c0_i32_0 = arith.constant 0 : i32
    %c0_i32_1 = arith.constant 0 : i32
    return %c0_i32, %c0_i32_0 : i32, i32
  }
}

</mosaic_0001>

<bundles_post_ra>
// kernel: lstm_model_forward.1
= control target key start
LH: loop header
LB: loop body
LE: loop exit
PB: predicated region body
PF: predicated region fallthrough
CT: control target
= control target key end

     0   :  { %v2378_v1 = vmov 0.0   ;;  %vm2379_vm0 = vmmov 0   ;;  %vm72_vm1 = vcmask 130048   ;;  %s2900_s0 = inlined_call_operand.vmem [shape: bf16[16,16], index: 0, kind: input, shape index: {}]   ;;  %s2901_s1 = inlined_call_operand.vmem [shape: bf16[16,128], index: 1, kind: input, shape index: {}]   ;;  %s2902_s2 = inlined_call_operand.vmem [shape: bf16[32,128], index: 2, kind: input, shape index: {}]   ;;  %s2903_s3 = inlined_call_operand.vmem [shape: f32[1,128], index: 3, kind: input, shape index: {}]   ;;  %s2904_s4 = inlined_call_operand.vmem [shape: bf16[64,128], index: 4, kind: input, shape index: {}]   ;;  %s2905_s5 = inlined_call_operand.vmem [shape: f32[1,128], index: 5, kind: input, shape index: {}]   ;;  %s2906_s6 = inlined_call_operand.vmem [shape: bf16[32,8], index: 6, kind: input, shape index: {}]   ;;  %s2907_s7 = inlined_call_operand.vmem [shape: f32[1,8], index: 7, kind: input, shape index: {}]   ;;  %s2908_s8 = inlined_call_operand.hbm [shape: f32[2,8], index: 8, kind: output, shape index: {}]  }
   0x1   :  { %v2145_v0 = vld [vmem:[%s2901_s1] sm:$0xff]   ;;  %1960 = vmatprep.subr.bf16.mxu0 %v2378_v1  ;;  %1966 = vmatprep.subr.bf16.mxu1 %v2378_v1  ;;  %v2448_v4 = vld [vmem:[%s2902_s2 + $0x8] sm:$0xff]  }
   0x2   :  { %v2437_v2 = vld [vmem:[%s2902_s2] sm:$0xff]   ;;  %1961 = vmatpush3.bf16.msra.mxu0 %v2145_v0  ;;  %1962 = vmatprep.mubr.msk.bf16.mxu0 %vm2379_vm0, %v2378_v1 }
   0x3   :  { %v2147_v3 = vld [vmem:[%s2900_s0] sm:$0xff]   ;;  %1967 = vmatpush3.bf16.msra.mxu1 %v2437_v2  ;;  %1970 = vmatprep.mubr.msk.bf16.mxu1 %vm2379_vm0, %v2378_v1 }
   0x4   :  { %1968 = vmatprep.subr.bf16.mxu1 %v2378_v1  ;;  %1974 = vmatprep.subr.bf16.mxu0 %v2378_v1 }
   0x5   :  { %1963 = vmatmul.mubr.msk.bf16.vlgmr.msra.gmra.mrb[0].mxu0 %vm72_vm1, %v2147_v3 }
   0x6   :  { %1982 = vmatprep.mubr.msk.bf16.mxu0 %vm2379_vm0, %v2378_v1 }
   0x7   :  { %1969 = vmatpush3.bf16.msra.mxu1 %v2448_v4 }
   0x8   :  { %1986 = vmatprep.subr.bf16.mxu1 %v2378_v1 }
   0x9   :  { %13 = vsyncpa [#allocation3], 0  ;;  %v2380_v5 = vmov 0   ;;  %v1838_v9 = vld [vmem:[%s2903_s3] ss:$0 sm:$0xff]  ;;  %s2381_s13 = smov 64  }
   0xa   :  { %1971 = vmatmul.mubr.bf16.vlgmr.msra.gmra.mrb[0].mxu1 %v2380_v5  ;;  %s2382_s3 = smov 32   ;;  %v2487_v41 = vld [vmem:[%s2904_s4] sm:$0xff]   ;;  %v2493_v42 = vld [vmem:[%s2904_s4 + $0x8] sm:$0xff]   ;;  %v2501_v44 = vld [vmem:[%s2904_s4 + $0x10] sm:$0xff]   ;;  %vm230_vm2 = vcmask 1041409   ;;  %vm129_vm3 = vcmask 261120  }
   0xb   :  { %1987 = vmatpush3.bf16.msra.mxu1 %v2437_v2  ;;  %1990 = vmatprep.mubr.msk.bf16.mxu1 %vm2379_vm0, %v2378_v1  ;;  %v2509_v45 = vld [vmem:[%s2904_s4 + $0x18] sm:$0xff]   ;;  %vm261_vm4 = vcmask 523264   ;;  %vm446_vm5 = vcmask 1042434   ;;  %vm650_vm6 = vcmask 1043459   ;;  %vm850_vm7 = vcmask 1044484   ;;  %s2383_s18 = smov [#allocation2]  }
   0xc   :  { %1988 = vmatprep.subr.bf16.mxu1 %v2378_v1  ;;  %1975 = vmatpush3.bf16.msra.mxu0 %v2487_v41  ;;  %vm1056_vm8 = vcmask 1045509   ;;  %vm1256_vm9 = vcmask 1046534   ;;  %vm1462_vm10 = vcmask 1047559   ;;  %vm1821_vm11 = vcmask 58368  }
   0xd   :  { %1976 = vmatprep.subr.bf16.mxu0 %v2378_v1 }
   0xf   :  { %1989 = vmatpush3.bf16.msra.mxu1 %v2448_v4 }
  0x10   :  { %1994 = vmatprep.subr.bf16.mxu1 %v2378_v1  ;;  %1977 = vmatpush3.bf16.msra.mxu0 %v2493_v42 }
  0x11   :  { %1978 = vmatprep.subr.bf16.mxu0 %v2378_v1 }
  0x14   :  { %1979 = vmatpush3.bf16.msra.mxu0 %v2501_v44 }
  0x15   :  { %1980 = vmatprep.subr.bf16.mxu0 %v2378_v1 }
  0x18   :  { %1981 = vmatpush3.bf16.msra.mxu0 %v2509_v45 }
  0x19   :  { %2006 = vmatprep.subr.bf16.mxu0 %v2378_v1 }
  0xd8   :  { %v110_v6 = vpop.f32.mrb[0].mxu0 }
  0xd9   :  { %v1964_v7 = vpop.f32.mrb[1].mxu0  ;;  %v2469_v15 = vadd.f32 %v1838_v9, %v110_v6 }
  0xda   :  { %v113_v8 = vpop.f32.mrb[2].mxu0 }
  0xdb   :  { %v1965_v10 = vpop.f32.mrb[3].mxu0  ;;  %v2467_v12 = vadd.f32 %v1838_v9, %v113_v8 }
  0xdd   :  { %v167_v11 = vpop.f32.mrb[0].mxu1 }
  0xde   :  { %v174_v13 = vrot.slane %v167_v11, 1  ;;  %v1972_v14 = vpop.f32.mrb[1].mxu1  ;;  %v177_v19 = vadd.f32 %v167_v11, %v2469_v15  ;;  %v2540_v11 = vld [vmem:[%s2905_s5] ss:$0 sm:$0xff] }
  0xdf   :  { %v170_v16 = vpop.f32.mrb[2].mxu1 }
  0xe0   :  { %v178_v17 = vadd.f32 %v174_v13, %v2467_v12  ;;  %v1973_v18 = vpop.f32.mrb[3].mxu1  ;;  %v1844_v23 = vmul.f32 -1.442695, %v177_v19 }
  0xe2   :  { %2155 = vtanh.f32 %v178_v17  ;;  %v1845_v22 = vmul.f32 -1.442695, %v178_v17 }
  0xe3   :  { %2157 = vtanh.f32 %v177_v19 }
  0xe4   :  { %2159 = vpow2.f32 %v1845_v22 }
  0xe5   :  { %2161 = vpow2.f32 %v1844_v23 }
  0xec   :  { %v2156_v20 = vpop.eup %2155 }
  0xed   :  { %199 = vrot.lane.b32.xlu0 %v2156_v20, %s2381_s13  ;;  %v2158_v21 = vpop.eup %2157 }
  0xee   :  { %v2160_v24 = vpop.eup %2159 }
  0xef   :  { %v186_v25 = vadd.f32 1.0, %v2160_v24  ;;  %v2162_v26 = vpop.eup %2161 }
  0xf0   :  { %v185_v27 = vadd.f32 1.0, %v2162_v26 }
  0xf1   :  { %197 = vrot.lane.b32.xlu0 %v2158_v21, %s2381_s13  ;;  %2163 = vrcp.f32 %v186_v25 }
  0xf2   :  { %2165 = vrcp.f32 %v185_v27 }
  0xfb   :  { %v2164_v28 = vpop.eup %2163 }
  0xfc   :  { %v2166_v31 = vpop.eup %2165  ;;  %v194_v34 = vmul.f32 0.0, %v2164_v28 }
  0xfd   :  { %v193_v37 = vmul.f32 0.0, %v2166_v31 }
 0x15f   :  { %v200_v29 = vpop.permute.xlu0 %199 }
 0x160   :  { %v204_v30 = vmul.f32 %v2164_v28, %v200_v29 }
 0x162   :  { %209 = vrot.lane.b32.xlu1 %v204_v30, %s2382_s3 }
 0x163   :  { %v198_v32 = vpop.permute.xlu0 %197 }
 0x164   :  { %v203_v33 = vmul.f32 %v2166_v31, %v198_v32 }
 0x166   :  { %207 = vrot.lane.b32.xlu1 %v203_v33, %s2382_s3 }
 0x1d4   :  { %v210_v35 = vpop.permute.xlu1 %209 }
 0x1d5   :  { %v2477_v36 = vadd.f32 %v210_v35, %v194_v34 }
 0x1d7   :  { %2167 = vtanh.f32 %v2477_v36 }
 0x1d8   :  { %v208_v38 = vpop.permute.xlu1 %207 }
 0x1d9   :  { %v2480_v39 = vadd.f32 %v208_v38, %v193_v37 }
 0x1db   :  { %2169 = vtanh.f32 %v2480_v39 }
 0x1e1   :  { %v2168_v40 = vpop.eup %2167 }
 0x1e2   :  { %221 = vrot.lane.b32.xlu0 %v2168_v40, %s2381_s13  ;;  %v406_v40 = vrot.slane %v2477_v36, 7 }
 0x1e5   :  { %v2170_v43 = vpop.eup %2169 }
 0x1e6   :  { %219 = vrot.lane.b32.xlu1 %v2170_v43, %s2381_s13 }
 0x254   :  { %v222_v46 = vpop.permute.xlu0 %221 }
 0x255   :  { %v226_v47 = vmul.f32 %v2164_v28, %v222_v46  ;;  %v405_v46 = vrot.slane %v2480_v39, 7 }
 0x257   :  { %v330_v48 = vpack.c.bf16 %v226_v47, %v226_v47  ;;  %v229_v50 = vrot.slane %v226_v47, 7 }
 0x258   :  { %v220_v49 = vpop.permute.xlu1 %219 }
 0x259   :  { %v334_v51 = vunpack.c.l.b16 %v330_v48  ;;  %v225_v52 = vmul.f32 %v2166_v31, %v220_v49 }
 0x25b   :  { %v329_v53 = vpack.c.bf16 %v225_v52, %v225_v52  ;;  %v231_v54 = vsel %vm230_vm2, %v229_v50, %v225_v52  ;;  %v335_v55 = vrot.slane %v334_v51, 7 }
 0x25c   :  { %232 = vrot.lane.b32.xlu1 %v231_v54, %s2382_s3 }
 0x25d   :  { %v333_v56 = vunpack.c.l.b16 %v329_v53 }
 0x25f   :  { %v336_v57 = vsel %vm230_vm2, %v335_v55, %v333_v56 }
 0x260   :  { %v337_v58 = vpack.c.b16 %v336_v57, %v336_v57 }
 0x262   :  { %338 = vrot.lane.b32.xlu0 %v337_v58, %s2382_s3 }
 0x2ce   :  { %v233_v59 = vpop.permute.xlu1 %232 }
 0x2cf   :  { %v235_v60 = vsel %vm129_vm3, %v233_v59, 0.0 }
 0x2d0   :  { %v236_v61 = vpack.c.bf16 %v235_v60, %v235_v60 }
 0x2d2   :  { %1983 = vmatmul.mubr.msk.bf16.vlgmr.msra.gmra.mrb[4].mxu0 %vm261_vm4, %v236_v61 }
 0x2d3   :  { %2007 = vmatpush3.bf16.msra.mxu0 %v2437_v2  ;;  %2010 = vmatprep.mubr.msk.bf16.mxu0 %vm2379_vm0, %v2378_v1 }
 0x2d4   :  { %v339_v62 = vpop.permute.xlu0 %338  ;;  %2008 = vmatprep.subr.bf16.mxu0 %v2378_v1 }
 0x2d5   :  { %1991 = vmatmul.mubr.msk.bf16.vlgmr.msra.gmra.mrb[4].mxu1 %vm129_vm3, %v339_v62 }
 0x2d6   :  { %1995 = vmatpush3.bf16.msra.mxu1 %v2487_v41  ;;  %2002 = vmatprep.mubr.msk.bf16.mxu1 %vm2379_vm0, %v2378_v1 }
 0x2d7   :  { %2009 = vmatpush3.bf16.msra.mxu0 %v2448_v4  ;;  %1996 = vmatprep.subr.bf16.mxu1 %v2378_v1 }
 0x2d8   :  { %2014 = vmatprep.subr.bf16.mxu0 %v2378_v1 }
 0x2da   :  { %1997 = vmatpush3.bf16.msra.mxu1 %v2493_v42 }
 0x2db   :  { %1998 = vmatprep.subr.bf16.mxu1 %v2378_v1 }
 0x2de   :  { %1999 = vmatpush3.bf16.msra.mxu1 %v2501_v44 }
 0x2df   :  { %2000 = vmatprep.subr.bf16.mxu1 %v2378_v1 }
 0x2e2   :  { %2001 = vmatpush3.bf16.msra.mxu1 %v2509_v45 }
 0x2e3   :  { %2026 = vmatprep.subr.bf16.mxu1 %v2378_v1 }
 0x3a5   :  { %v299_v63 = vpop.f32.mrb[4].mxu0 }
 0x3a6   :  { %v1984_v0 = vpop.f32.mrb[5].mxu0  ;;  %v300_v16 = vadd.f32 %v2540_v11, %v299_v63 }
 0x3a7   :  { %v302_v3 = vpop.f32.mrb[6].mxu0 }
 0x3a8   :  { %v1985_v5 = vpop.f32.mrb[7].mxu0  ;;  %v377_v6 = vpop.f32.mrb[4].mxu1  ;;  %v1851_v22 = vmul.f32 -1.442695, %v300_v16 }
 0x3a9   :  { %v384_v7 = vrot.slane %v377_v6, 7  ;;  %v388_v8 = vadd.f32 %v377_v6, %v2467_v12  ;;  %v1992_v9 = vpop.f32.mrb[5].mxu1 }
 0x3aa   :  { %v380_v10 = vpop.f32.mrb[6].mxu1 }
 0x3ab   :  { %v387_v13 = vadd.f32 %v384_v7, %v2469_v15  ;;  %2171 = vtanh.f32 %v388_v8  ;;  %v1993_v14 = vpop.f32.mrb[7].mxu1  ;;  %v1854_v20 = vmul.f32 -1.442695, %v388_v8 }
 0x3ad   :  { %2173 = vtanh.f32 %v387_v13  ;;  %v1853_v21 = vmul.f32 -1.442695, %v387_v13 }
 0x3ae   :  { %2175 = vtanh.f32 %v300_v16 }
 0x3af   :  { %2177 = vpow2.f32 %v1854_v20 }
 0x3b0   :  { %2179 = vpow2.f32 %v1853_v21 }
 0x3b1   :  { %2181 = vpow2.f32 %v1851_v22 }
 0x3b5   :  { %v2172_v17 = vpop.eup %2171 }
 0x3b6   :  { %415 = vrot.lane.b32.xlu1 %v2172_v17, %s2381_s13 }
 0x3b7   :  { %v2174_v18 = vpop.eup %2173 }
 0x3b8   :  { %413 = vrot.lane.b32.xlu0 %v2174_v18, %s2381_s13  ;;  %v2176_v19 = vpop.eup %2175 }
 0x3b9   :  { %v2178_v23 = vpop.eup %2177 }
 0x3ba   :  { %v2180_v24 = vpop.eup %2179  ;;  %v396_v25 = vadd.f32 1.0, %v2178_v23 }
 0x3bb   :  { %v395_v26 = vadd.f32 1.0, %v2180_v24  ;;  %v2182_v27 = vpop.eup %2181 }
 0x3bc   :  { %314 = vrot.lane.b32.xlu0 %v2176_v19, %s2381_s13  ;;  %2183 = vrcp.f32 %v396_v25  ;;  %v308_v28 = vadd.f32 1.0, %v2182_v27 }
 0x3bd   :  { %2185 = vrcp.f32 %v395_v26 }
 0x3be   :  { %2187 = vrcp.f32 %v308_v28 }
 0x3c6   :  { %v2184_v29 = vpop.eup %2183 }
 0x3c7   :  { %v2186_v32 = vpop.eup %2185  ;;  %v410_v43 = vmul.f32 %v2184_v29, %v406_v40 }
 0x3c8   :  { %v2188_v35 = vpop.eup %2187  ;;  %v409_v49 = vmul.f32 %v2186_v32, %v405_v46 }
 0x3c9   :  { %v312_v52 = vmul.f32 0.0, %v2188_v35 }
 0x428   :  { %v416_v30 = vpop.permute.xlu1 %415 }
 0x429   :  { %v420_v31 = vmul.f32 %v2184_v29, %v416_v30 }
 0x42a   :  { %v414_v33 = vpop.permute.xlu0 %413 }
 0x42b   :  { %425 = vrot.lane.b32.xlu0 %v420_v31, %s2382_s3  ;;  %v419_v34 = vmul.f32 %v2186_v32, %v414_v33 }
 0x42d   :  { %423 = vrot.lane.b32.xlu1 %v419_v34, %s2382_s3 }
 0x42e   :  { %v315_v37 = vpop.permute.xlu0 %314 }
 0x42f   :  { %v317_v38 = vmul.f32 %v2188_v35, %v315_v37 }
 0x431   :  { %319 = vrot.lane.b32.xlu1 %v317_v38, %s2382_s3 }
 0x49d   :  { %v426_v47 = vpop.permute.xlu0 %425 }
 0x49e   :  { %v2552_v48 = vadd.f32 %v426_v47, %v410_v43 }
 0x49f   :  { %v424_v50 = vpop.permute.xlu1 %423 }
 0x4a0   :  { %2189 = vtanh.f32 %v2552_v48  ;;  %v2555_v51 = vadd.f32 %v424_v50, %v409_v49 }
 0x4a2   :  { %2191 = vtanh.f32 %v2555_v51 }
 0x4a3   :  { %v320_v53 = vpop.permute.xlu1 %319 }
 0x4a4   :  { %v2558_v54 = vadd.f32 %v320_v53, %v312_v52 }
 0x4a6   :  { %2193 = vtanh.f32 %v2558_v54 }
 0x4aa   :  { %v2190_v36 = vpop.eup %2189 }
 0x4ab   :  { %437 = vrot.lane.b32.xlu1 %v2190_v36, %s2381_s13 }
 0x4ac   :  { %v2192_v39 = vpop.eup %2191 }
 0x4ad   :  { %435 = vrot.lane.b32.xlu0 %v2192_v39, %s2381_s13 }
 0x4b0   :  { %v2194_v55 = vpop.eup %2193 }
 0x4b1   :  { %325 = vrot.lane.b32.xlu0 %v2194_v55, %s2381_s13 }
 0x51d   :  { %v438_v56 = vpop.permute.xlu1 %437 }
 0x51e   :  { %v442_v57 = vmul.f32 %v2184_v29, %v438_v56 }
 0x51f   :  { %v436_v59 = vpop.permute.xlu0 %435 }
 0x520   :  { %v445_v58 = vrot.slane %v442_v57, 7  ;;  %v441_v60 = vmul.f32 %v2186_v32, %v436_v59  ;;  %v533_v61 = vpack.c.bf16 %v442_v57, %v442_v57 }
 0x522   :  { %v532_v62 = vpack.c.bf16 %v441_v60, %v441_v60  ;;  %v447_v63 = vsel %vm446_vm5, %v445_v58, %v441_v60  ;;  %v537_v3 = vunpack.c.l.b16 %v533_v61 }
 0x523   :  { %448 = vrot.lane.b32.xlu0 %v447_v63, %s2382_s3  ;;  %v326_v6 = vpop.permute.xlu0 %325 }
 0x524   :  { %v536_v0 = vunpack.c.l.b16 %v532_v62  ;;  %v328_v8 = vmul.f32 %v2188_v35, %v326_v6 }
 0x526   :  { %v538_v5 = vrot.slane %v536_v0, 1  ;;  %v452_v10 = vrot.slane %v328_v8, 7  ;;  %v609_v0 = vrot.slane %v2555_v51, 7 }
 0x528   :  { %v539_v7 = vsel %vm230_vm2, %v537_v3, %v538_v5  ;;  %v610_v3 = vrot.slane %v2552_v48, 7 }
 0x529   :  { %v540_v9 = vpack.c.b16 %v539_v7, %v539_v7 }
 0x52b   :  { %541 = vrot.lane.b32.xlu1 %v540_v9, %s2382_s3 }
 0x52f   :  { %453 = vrot.lane.b32.xlu1 %v452_v10, %s2381_s13 }
 0x595   :  { %v449_v14 = vpop.permute.xlu0 %448 }
 0x59d   :  { %v542_v13 = vpop.permute.xlu1 %541 }
 0x59e   :  { %2011 = vmatmul.mubr.msk.bf16.vlgmr.msra.gmra.mrb[8].mxu0 %vm129_vm3, %v542_v13 }
 0x59f   :  { %2015 = vmatpush3.bf16.msra.mxu0 %v2487_v41  ;;  %2022 = vmatprep.mubr.msk.bf16.mxu0 %vm2379_vm0, %v2378_v1 }
 0x5a0   :  { %2016 = vmatprep.subr.bf16.mxu0 %v2378_v1 }
 0x5a1   :  { %v454_v16 = vpop.permute.xlu1 %453 }
 0x5a2   :  { %v456_v17 = vsel %vm129_vm3, %v449_v14, %v454_v16 }
 0x5a3   :  { %v457_v18 = vpack.c.bf16 %v456_v17, %v456_v17  ;;  %2017 = vmatpush3.bf16.msra.mxu0 %v2493_v42 }
 0x5a4   :  { %2018 = vmatprep.subr.bf16.mxu0 %v2378_v1 }
 0x5a5   :  { %v461_v19 = vshll.u32 %v457_v18, 16  ;;  %v459_v20 = vshrl.u32 %v457_v18, 16 }
 0x5a7   :  { %v463_v21 = vrot.slane %v461_v19, 1  ;;  %2019 = vmatpush3.bf16.msra.mxu0 %v2501_v44 }
 0x5a8   :  { %2020 = vmatprep.subr.bf16.mxu0 %v2378_v1 }
 0x5a9   :  { %v464_v22 = vor.u32 %v463_v21, %v459_v20 }
 0x5ab   :  { %2003 = vmatmul.mubr.msk.bf16.vlgmr.msra.gmra.mrb[8].mxu1 %vm261_vm4, %v464_v22  ;;  %2021 = vmatpush3.bf16.msra.mxu0 %v2509_v45 }
 0x5ac   :  { %2027 = vmatpush3.bf16.msra.mxu1 %v2437_v2  ;;  %2030 = vmatprep.mubr.msk.bf16.mxu1 %vm2379_vm0, %v2378_v1 }
 0x5ad   :  { %2028 = vmatprep.subr.bf16.mxu1 %v2378_v1  ;;  %2046 = vmatprep.subr.bf16.mxu0 %v2378_v1 }
 0x5b0   :  { %2029 = vmatpush3.bf16.msra.mxu1 %v2448_v4 }
 0x5b1   :  { %2034 = vmatprep.subr.bf16.mxu1 %v2378_v1 }
 0x671   :  { %v580_v23 = vpop.f32.mrb[8].mxu0 }
 0x672   :  { %v587_v24 = vrot.slane %v580_v23, 6  ;;  %v588_v25 = vrot.slane %v580_v23, 7  ;;  %v2012_v26 = vpop.f32.mrb[9].mxu0 }
 0x673   :  { %v583_v27 = vpop.f32.mrb[10].mxu0 }
 0x674   :  { %v591_v28 = vadd.f32 %v587_v24, %v2469_v15  ;;  %v592_v29 = vadd.f32 %v588_v25, %v2467_v12  ;;  %v2013_v30 = vpop.f32.mrb[11].mxu0 }
 0x676   :  { %2195 = vtanh.f32 %v591_v28  ;;  %v1858_v43 = vmul.f32 -1.442695, %v591_v28  ;;  %v1859_v46 = vmul.f32 -1.442695, %v592_v29 }
 0x677   :  { %2197 = vtanh.f32 %v592_v29 }
 0x67e   :  { %v502_v31 = vpop.f32.mrb[8].mxu1 }
 0x67f   :  { %v503_v32 = vadd.f32 %v2540_v11, %v502_v31  ;;  %v2004_v33 = vpop.f32.mrb[9].mxu1 }
 0x680   :  { %v2196_v34 = vpop.eup %2195  ;;  %v505_v35 = vpop.f32.mrb[10].mxu1 }
 0x681   :  { %v2198_v37 = vpop.eup %2197  ;;  %2199 = vtanh.f32 %v503_v32  ;;  %617 = vrot.lane.b32.xlu0 %v2196_v34, %s2381_s13  ;;  %v2005_v38 = vpop.f32.mrb[11].mxu1  ;;  %v1856_v47 = vmul.f32 -1.442695, %v503_v32 }
 0x682   :  { %619 = vrot.lane.b32.xlu1 %v2198_v37, %s2381_s13  ;;  %2201 = vpow2.f32 %v1858_v43 }
 0x683   :  { %2203 = vpow2.f32 %v1859_v46 }
 0x684   :  { %2205 = vpow2.f32 %v1856_v47 }
 0x68b   :  { %v2200_v40 = vpop.eup %2199 }
 0x68c   :  { %517 = vrot.lane.b32.xlu0 %v2200_v40, %s2381_s13  ;;  %v2202_v49 = vpop.eup %2201 }
 0x68d   :  { %v2204_v50 = vpop.eup %2203  ;;  %v599_v52 = vadd.f32 1.0, %v2202_v49 }
 0x68e   :  { %v600_v53 = vadd.f32 1.0, %v2204_v50  ;;  %v2206_v36 = vpop.eup %2205 }
 0x68f   :  { %2207 = vrcp.f32 %v599_v52  ;;  %v511_v39 = vadd.f32 1.0, %v2206_v36 }
 0x690   :  { %2209 = vrcp.f32 %v600_v53 }
 0x691   :  { %2211 = vrcp.f32 %v511_v39 }
 0x699   :  { %v2208_v55 = vpop.eup %2207 }
 0x69a   :  { %v2210_v57 = vpop.eup %2209  ;;  %v613_v5 = vmul.f32 %v2208_v55, %v609_v0 }
 0x69b   :  { %v2212_v61 = vpop.eup %2211  ;;  %v614_v7 = vmul.f32 %v2210_v57, %v610_v3 }
 0x69c   :  { %v515_v13 = vmul.f32 %v2212_v61, %v2558_v54 }
 0x6f3   :  { %v618_v56 = vpop.permute.xlu0 %617 }
 0x6f4   :  { %v620_v58 = vpop.permute.xlu1 %619  ;;  %v623_v59 = vmul.f32 %v2208_v55, %v618_v56 }
 0x6f5   :  { %v624_v60 = vmul.f32 %v2210_v57, %v620_v58 }
 0x6f6   :  { %627 = vrot.lane.b32.xlu1 %v623_v59, %s2382_s3 }
 0x6f7   :  { %629 = vrot.lane.b32.xlu0 %v624_v60, %s2382_s3 }
 0x6fe   :  { %v518_v62 = vpop.permute.xlu0 %517 }
 0x6ff   :  { %v520_v63 = vmul.f32 %v2212_v61, %v518_v62 }
 0x701   :  { %522 = vrot.lane.b32.xlu1 %v520_v63, %s2382_s3 }
 0x768   :  { %v628_v6 = vpop.permute.xlu1 %627 }
 0x769   :  { %v2598_v8 = vadd.f32 %v628_v6, %v613_v5  ;;  %v630_v9 = vpop.permute.xlu0 %629 }
 0x76a   :  { %v2600_v10 = vadd.f32 %v630_v9, %v614_v7 }
 0x76b   :  { %2213 = vtanh.f32 %v2598_v8 }
 0x76c   :  { %2215 = vtanh.f32 %v2600_v10 }
 0x773   :  { %v523_v14 = vpop.permute.xlu1 %522 }
 0x774   :  { %v2605_v16 = vadd.f32 %v523_v14, %v515_v13 }
 0x775   :  { %v2214_v51 = vpop.eup %2213 }
 0x776   :  { %v2216_v17 = vpop.eup %2215  ;;  %2217 = vtanh.f32 %v2605_v16  ;;  %639 = vrot.lane.b32.xlu0 %v2214_v51, %s2381_s13 }
 0x777   :  { %641 = vrot.lane.b32.xlu1 %v2216_v17, %s2381_s13 }
 0x780   :  { %v2218_v48 = vpop.eup %2217 }
 0x781   :  { %528 = vrot.lane.b32.xlu0 %v2218_v48, %s2381_s13 }
 0x7e8   :  { %v640_v18 = vpop.permute.xlu0 %639 }
 0x7e9   :  { %v645_v19 = vmul.f32 %v2208_v55, %v640_v18  ;;  %v642_v20 = vpop.permute.xlu1 %641 }
 0x7ea   :  { %v646_v21 = vmul.f32 %v2210_v57, %v642_v20 }
 0x7eb   :  { %v731_v22 = vpack.c.bf16 %v645_v19, %v645_v19 }
 0x7ec   :  { %v649_v54 = vrot.slane %v646_v21, 7  ;;  %v732_v23 = vpack.c.bf16 %v646_v21, %v646_v21 }
 0x7ed   :  { %v735_v24 = vunpack.c.l.b16 %v731_v22 }
 0x7ee   :  { %v736_v25 = vunpack.c.l.b16 %v732_v23  ;;  %v651_v26 = vsel %vm650_vm6, %v649_v54, %v645_v19  ;;  %v809_v23 = vrot.slane %v2598_v8, 7 }
 0x7ef   :  { %v737_v27 = vrot.slane %v735_v24, 2  ;;  %652 = vrot.lane.b32.xlu0 %v651_v26, %s2382_s3  ;;  %v810_v24 = vrot.slane %v2600_v10, 7 }
 0x7f0   :  { %v738_v28 = vrot.slane %v736_v25, 1 }
 0x7f2   :  { %v739_v29 = vsel %vm230_vm2, %v738_v28, %v737_v27 }
 0x7f3   :  { %v529_v30 = vpop.permute.xlu0 %528  ;;  %v740_v31 = vpack.c.b16 %v739_v29, %v739_v29 }
 0x7f4   :  { %v531_v32 = vmul.f32 %v2212_v61, %v529_v30 }
 0x7f5   :  { %741 = vrot.lane.b32.xlu1 %v740_v31, %s2382_s3 }
 0x7f6   :  { %v656_v33 = vrot.slane %v531_v32, 6 }
 0x7f9   :  { %657 = vrot.lane.b32.xlu1 %v656_v33, %s2381_s13 }
 0x861   :  { %v653_v35 = vpop.permute.xlu0 %652 }
 0x867   :  { %v742_v34 = vpop.permute.xlu1 %741 }
 0x868   :  { %2031 = vmatmul.mubr.msk.bf16.vlgmr.msra.gmra.mrb[12].mxu1 %vm129_vm3, %v742_v34 }
 0x869   :  { %2035 = vmatpush3.bf16.msra.mxu1 %v2487_v41  ;;  %2042 = vmatprep.mubr.msk.bf16.mxu1 %vm2379_vm0, %v2378_v1 }
 0x86a   :  { %2036 = vmatprep.subr.bf16.mxu1 %v2378_v1 }
 0x86b   :  { %v658_v37 = vpop.permute.xlu1 %657 }
 0x86c   :  { %v660_v38 = vsel %vm129_vm3, %v653_v35, %v658_v37 }
 0x86d   :  { %v661_v40 = vpack.c.bf16 %v660_v38, %v660_v38  ;;  %2037 = vmatpush3.bf16.msra.mxu1 %v2493_v42 }
 0x86e   :  { %2038 = vmatprep.subr.bf16.mxu1 %v2378_v1 }
 0x86f   :  { %v663_v43 = vrot.slane %v661_v40, 1 }
 0x871   :  { %2023 = vmatmul.mubr.msk.bf16.vlgmr.msra.gmra.mrb[12].mxu0 %vm261_vm4, %v663_v43  ;;  %2039 = vmatpush3.bf16.msra.mxu1 %v2501_v44 }
 0x872   :  { %2047 = vmatpush3.bf16.msra.mxu0 %v2437_v2  ;;  %2050 = vmatprep.mubr.msk.bf16.mxu0 %vm2379_vm0, %v2378_v1 }
 0x873   :  { %2048 = vmatprep.subr.bf16.mxu0 %v2378_v1  ;;  %2040 = vmatprep.subr.bf16.mxu1 %v2378_v1 }
 0x875   :  { %2041 = vmatpush3.bf16.msra.mxu1 %v2509_v45 }
 0x876   :  { %2049 = vmatpush3.bf16.msra.mxu0 %v2448_v4  ;;  %2066 = vmatprep.subr.bf16.mxu1 %v2378_v1 }
 0x877   :  { %2054 = vmatprep.subr.bf16.mxu0 %v2378_v1 }
 0x93b   :  { %v780_v46 = vpop.f32.mrb[12].mxu1 }
 0x93c   :  { %v787_v47 = vrot.slane %v780_v46, 5  ;;  %v788_v49 = vrot.slane %v780_v46, 6  ;;  %v2032_v50 = vpop.f32.mrb[13].mxu1 }
 0x93d   :  { %v783_v52 = vpop.f32.mrb[14].mxu1 }
 0x93e   :  { %v791_v53 = vadd.f32 %v787_v47, %v2469_v15  ;;  %v792_v36 = vadd.f32 %v788_v49, %v2467_v12  ;;  %v2033_v39 = vpop.f32.mrb[15].mxu1 }
 0x940   :  { %2219 = vtanh.f32 %v791_v53  ;;  %v1863_v63 = vmul.f32 -1.442695, %v791_v53  ;;  %v1864_v0 = vmul.f32 -1.442695, %v792_v36 }
 0x941   :  { %2221 = vtanh.f32 %v792_v36 }
 0x944   :  { %v701_v55 = vpop.f32.mrb[12].mxu0 }
 0x945   :  { %v702_v56 = vadd.f32 %v2540_v11, %v701_v55  ;;  %v2024_v57 = vpop.f32.mrb[13].mxu0 }
 0x946   :  { %v704_v58 = vpop.f32.mrb[14].mxu0 }
 0x947   :  { %2223 = vtanh.f32 %v702_v56  ;;  %v2025_v59 = vpop.f32.mrb[15].mxu0  ;;  %v1861_v3 = vmul.f32 -1.442695, %v702_v56 }
 0x948   :  { %2225 = vpow2.f32 %v1863_v63 }
 0x949   :  { %2227 = vpow2.f32 %v1864_v0 }
 0x94a   :  { %v2220_v60 = vpop.eup %2219  ;;  %2229 = vpow2.f32 %v1861_v3 }
 0x94b   :  { %v2222_v61 = vpop.eup %2221  ;;  %817 = vrot.lane.b32.xlu0 %v2220_v60, %s2381_s13 }
 0x94c   :  { %819 = vrot.lane.b32.xlu1 %v2222_v61, %s2381_s13 }
 0x951   :  { %v2224_v62 = vpop.eup %2223 }
 0x952   :  { %716 = vrot.lane.b32.xlu0 %v2224_v62, %s2381_s13  ;;  %v2226_v5 = vpop.eup %2225 }
 0x953   :  { %v2228_v6 = vpop.eup %2227  ;;  %v799_v7 = vadd.f32 1.0, %v2226_v5 }
 0x954   :  { %v800_v9 = vadd.f32 1.0, %v2228_v6  ;;  %v2230_v13 = vpop.eup %2229 }
 0x955   :  { %2231 = vrcp.f32 %v799_v7  ;;  %v710_v14 = vadd.f32 1.0, %v2230_v13 }
 0x956   :  { %2233 = vrcp.f32 %v800_v9 }
 0x957   :  { %2235 = vrcp.f32 %v710_v14 }
 0x95f   :  { %v2232_v51 = vpop.eup %2231 }
 0x960   :  { %v2234_v48 = vpop.eup %2233  ;;  %v813_v25 = vmul.f32 %v2232_v51, %v809_v23 }
 0x961   :  { %v2236_v21 = vpop.eup %2235  ;;  %v814_v26 = vmul.f32 %v2234_v48, %v810_v24 }
 0x962   :  { %v714_v31 = vmul.f32 %v2236_v21, %v2605_v16 }
 0x9bd   :  { %v818_v17 = vpop.permute.xlu0 %817 }
 0x9be   :  { %v820_v18 = vpop.permute.xlu1 %819  ;;  %v823_v19 = vmul.f32 %v2232_v51, %v818_v17 }
 0x9bf   :  { %v824_v20 = vmul.f32 %v2234_v48, %v820_v18 }
 0x9c0   :  { %827 = vrot.lane.b32.xlu1 %v823_v19, %s2382_s3 }
 0x9c1   :  { %829 = vrot.lane.b32.xlu0 %v824_v20, %s2382_s3 }
 0x9c4   :  { %v717_v22 = vpop.permute.xlu0 %716 }
 0x9c5   :  { %v719_v54 = vmul.f32 %v2236_v21, %v717_v22 }
 0x9c7   :  { %721 = vrot.lane.b32.xlu1 %v719_v54, %s2382_s3 }
 0xa32   :  { %v828_v27 = vpop.permute.xlu1 %827 }
 0xa33   :  { %v830_v28 = vpop.permute.xlu0 %829  ;;  %v2645_v29 = vadd.f32 %v828_v27, %v813_v25 }
 0xa34   :  { %v2647_v30 = vadd.f32 %v830_v28, %v814_v26 }
 0xa35   :  { %2237 = vtanh.f32 %v2645_v29 }
 0xa36   :  { %2239 = vtanh.f32 %v2647_v30 }
 0xa39   :  { %v722_v32 = vpop.permute.xlu1 %721 }
 0xa3a   :  { %v2652_v33 = vadd.f32 %v722_v32, %v714_v31 }
 0xa3c   :  { %2241 = vtanh.f32 %v2652_v33 }
 0xa3f   :  { %v2238_v8 = vpop.eup %2237 }
 0xa40   :  { %v2240_v10 = vpop.eup %2239  ;;  %839 = vrot.lane.b32.xlu0 %v2238_v8, %s2381_s13 }
 0xa41   :  { %841 = vrot.lane.b32.xlu1 %v2240_v10, %s2381_s13 }
 0xa46   :  { %v2242_v34 = vpop.eup %2241 }
 0xa47   :  { %727 = vrot.lane.b32.xlu0 %v2242_v34, %s2381_s13 }
 0xab2   :  { %v840_v35 = vpop.permute.xlu0 %839 }
 0xab3   :  { %v842_v37 = vpop.permute.xlu1 %841  ;;  %v845_v38 = vmul.f32 %v2232_v51, %v840_v35 }
 0xab4   :  { %v846_v40 = vmul.f32 %v2234_v48, %v842_v37 }
 0xab5   :  { %v937_v43 = vpack.c.bf16 %v845_v38, %v845_v38 }
 0xab6   :  { %v849_v16 = vrot.slane %v846_v40, 7  ;;  %v938_v46 = vpack.c.bf16 %v846_v40, %v846_v40 }
 0xab7   :  { %v941_v47 = vunpack.c.l.b16 %v937_v43 }
 0xab8   :  { %v942_v49 = vunpack.c.l.b16 %v938_v46  ;;  %v851_v50 = vsel %vm850_vm7, %v849_v16, %v845_v38 }
 0xab9   :  { %v943_v52 = vrot.slane %v941_v47, 3  ;;  %852 = vrot.lane.b32.xlu0 %v851_v50, %s2382_s3  ;;  %v728_v36 = vpop.permute.xlu0 %727  ;;  %v1016_v50 = vrot.slane %v2647_v30, 7 }
 0xaba   :  { %v944_v53 = vrot.slane %v942_v49, 2  ;;  %v730_v55 = vmul.f32 %v2236_v21, %v728_v36  ;;  %v1015_v49 = vrot.slane %v2645_v29, 7 }
 0xabc   :  { %v945_v39 = vsel %vm230_vm2, %v944_v53, %v943_v52  ;;  %v856_v57 = vrot.slane %v730_v55, 5 }
 0xabd   :  { %v946_v56 = vpack.c.b16 %v945_v39, %v945_v39 }
 0xabf   :  { %947 = vrot.lane.b32.xlu1 %v946_v56, %s2382_s3 }
 0xac3   :  { %857 = vrot.lane.b32.xlu1 %v856_v57, %s2381_s13 }
 0xb2b   :  { %v853_v59 = vpop.permute.xlu0 %852 }
 0xb31   :  { %v948_v58 = vpop.permute.xlu1 %947 }
 0xb32   :  { %2051 = vmatmul.mubr.msk.bf16.vlgmr.msra.gmra.mrb[16].mxu0 %vm129_vm3, %v948_v58 }
 0xb33   :  { %2055 = vmatpush3.bf16.msra.mxu0 %v2487_v41  ;;  %2062 = vmatprep.mubr.msk.bf16.mxu0 %vm2379_vm0, %v2378_v1 }
 0xb34   :  { %2056 = vmatprep.subr.bf16.mxu0 %v2378_v1 }
 0xb35   :  { %v858_v60 = vpop.permute.xlu1 %857 }
 0xb36   :  { %v860_v61 = vsel %vm129_vm3, %v853_v59, %v858_v60 }
 0xb37   :  { %v861_v62 = vpack.c.bf16 %v860_v61, %v860_v61  ;;  %2057 = vmatpush3.bf16.msra.mxu0 %v2493_v42 }
 0xb38   :  { %2058 = vmatprep.subr.bf16.mxu0 %v2378_v1 }
 0xb39   :  { %v863_v63 = vshrl.u32 %v861_v62, 16  ;;  %v866_v0 = vshll.u32 %v861_v62, 16 }
 0xb3b   :  { %v865_v3 = vrot.slane %v863_v63, 1  ;;  %v868_v5 = vrot.slane %v866_v0, 2  ;;  %2059 = vmatpush3.bf16.msra.mxu0 %v2501_v44 }
 0xb3c   :  { %2060 = vmatprep.subr.bf16.mxu0 %v2378_v1 }
 0xb3d   :  { %v869_v6 = vor.u32 %v868_v5, %v865_v3 }
 0xb3f   :  { %2043 = vmatmul.mubr.msk.bf16.vlgmr.msra.gmra.mrb[16].mxu1 %vm261_vm4, %v869_v6  ;;  %2061 = vmatpush3.bf16.msra.mxu0 %v2509_v45 }
 0xb40   :  { %2067 = vmatpush3.bf16.msra.mxu1 %v2437_v2  ;;  %2070 = vmatprep.mubr.msk.bf16.mxu1 %vm2379_vm0, %v2378_v1 }
 0xb41   :  { %2068 = vmatprep.subr.bf16.mxu1 %v2378_v1  ;;  %2086 = vmatprep.subr.bf16.mxu0 %v2378_v1 }
 0xb44   :  { %2069 = vmatpush3.bf16.msra.mxu1 %v2448_v4 }
 0xb45   :  { %2074 = vmatprep.subr.bf16.mxu1 %v2378_v1 }
 0xc05   :  { %v986_v7 = vpop.f32.mrb[16].mxu0 }
 0xc06   :  { %v993_v9 = vrot.slane %v986_v7, 4  ;;  %v994_v13 = vrot.slane %v986_v7, 5  ;;  %v2052_v14 = vpop.f32.mrb[17].mxu0 }
 0xc07   :  { %v989_v51 = vpop.f32.mrb[18].mxu0 }
 0xc08   :  { %v997_v17 = vadd.f32 %v993_v9, %v2469_v15  ;;  %v998_v2 = vadd.f32 %v994_v13, %v2467_v12  ;;  %v2053_v48 = vpop.f32.mrb[19].mxu0 }
 0xc0a   :  { %2243 = vtanh.f32 %v997_v17  ;;  %v1868_v24 = vmul.f32 -1.442695, %v997_v17  ;;  %v1869_v25 = vmul.f32 -1.442695, %v998_v2 }
 0xc0b   :  { %2245 = vtanh.f32 %v998_v2 }
 0xc12   :  { %v907_v18 = vpop.f32.mrb[16].mxu1 }
 0xc13   :  { %v908_v19 = vadd.f32 %v2540_v11, %v907_v18  ;;  %v2044_v20 = vpop.f32.mrb[17].mxu1 }
 0xc14   :  { %v2244_v21 = vpop.eup %2243  ;;  %v910_v4 = vpop.f32.mrb[18].mxu1 }
 0xc15   :  { %v2246_v22 = vpop.eup %2245  ;;  %2247 = vtanh.f32 %v908_v19  ;;  %1023 = vrot.lane.b32.xlu0 %v2244_v21, %s2381_s13  ;;  %v2045_v54 = vpop.f32.mrb[19].mxu1  ;;  %v1866_v26 = vmul.f32 -1.442695, %v908_v19 }
 0xc16   :  { %1025 = vrot.lane.b32.xlu1 %v2246_v22, %s2381_s13  ;;  %2249 = vpow2.f32 %v1868_v24 }
 0xc17   :  { %2251 = vpow2.f32 %v1869_v25 }
 0xc18   :  { %2253 = vpow2.f32 %v1866_v26 }
 0xc1f   :  { %v2248_v23 = vpop.eup %2247 }
 0xc20   :  { %922 = vrot.lane.b32.xlu0 %v2248_v23, %s2381_s13  ;;  %v2250_v27 = vpop.eup %2249 }
 0xc21   :  { %v2252_v28 = vpop.eup %2251  ;;  %v1005_v31 = vadd.f32 1.0, %v2250_v27 }
 0xc22   :  { %v1006_v32 = vadd.f32 1.0, %v2252_v28  ;;  %v2254_v8 = vpop.eup %2253 }
 0xc23   :  { %2255 = vrcp.f32 %v1005_v31  ;;  %v916_v10 = vadd.f32 1.0, %v2254_v8 }
 0xc24   :  { %2257 = vrcp.f32 %v1006_v32 }
 0xc25   :  { %2259 = vrcp.f32 %v916_v10 }
 0xc2d   :  { %v2256_v34 = vpop.eup %2255 }
 0xc2e   :  { %v2258_v37 = vpop.eup %2257  ;;  %v1019_v52 = vmul.f32 %v2256_v34, %v1015_v49 }
 0xc2f   :  { %v2260_v16 = vpop.eup %2259  ;;  %v1020_v36 = vmul.f32 %v2258_v37, %v1016_v50 }
 0xc30   :  { %v920_v57 = vmul.f32 %v2260_v16, %v2652_v33 }
 0xc87   :  { %v1024_v35 = vpop.permute.xlu0 %1023 }
 0xc88   :  { %v1026_v38 = vpop.permute.xlu1 %1025  ;;  %v1029_v40 = vmul.f32 %v2256_v34, %v1024_v35 }
 0xc89   :  { %v1030_v43 = vmul.f32 %v2258_v37, %v1026_v38 }
 0xc8a   :  { %1033 = vrot.lane.b32.xlu1 %v1029_v40, %s2382_s3 }
 0xc8b   :  { %1035 = vrot.lane.b32.xlu0 %v1030_v43, %s2382_s3 }
 0xc92   :  { %v923_v46 = vpop.permute.xlu0 %922 }
 0xc93   :  { %v925_v47 = vmul.f32 %v2260_v16, %v923_v46 }
 0xc95   :  { %927 = vrot.lane.b32.xlu1 %v925_v47, %s2382_s3 }
 0xcfc   :  { %v1034_v53 = vpop.permute.xlu1 %1033 }
 0xcfd   :  { %v2692_v39 = vadd.f32 %v1034_v53, %v1019_v52  ;;  %v1036_v55 = vpop.permute.xlu0 %1035 }
 0xcfe   :  { %v2694_v56 = vadd.f32 %v1036_v55, %v1020_v36 }
 0xcff   :  { %2261 = vtanh.f32 %v2692_v39 }
 0xd00   :  { %2263 = vtanh.f32 %v2694_v56 }
 0xd07   :  { %v928_v58 = vpop.permute.xlu1 %927 }
 0xd08   :  { %v2699_v59 = vadd.f32 %v928_v58, %v920_v57 }
 0xd09   :  { %v2262_v29 = vpop.eup %2261 }
 0xd0a   :  { %v2264_v60 = vpop.eup %2263  ;;  %2265 = vtanh.f32 %v2699_v59  ;;  %1045 = vrot.lane.b32.xlu0 %v2262_v29, %s2381_s13 }
 0xd0b   :  { %1047 = vrot.lane.b32.xlu1 %v2264_v60, %s2381_s13 }
 0xd14   :  { %v2266_v30 = vpop.eup %2265 }
 0xd15   :  { %933 = vrot.lane.b32.xlu0 %v2266_v30, %s2381_s13 }
 0xd7c   :  { %v1046_v61 = vpop.permute.xlu0 %1045 }
 0xd7d   :  { %v1051_v62 = vmul.f32 %v2256_v34, %v1046_v61  ;;  %v1048_v63 = vpop.permute.xlu1 %1047 }
 0xd7e   :  { %v1052_v0 = vmul.f32 %v2258_v37, %v1048_v63  ;;  %v1216_v63 = vrot.slane %v2694_v56, 7 }
 0xd7f   :  { %v1137_v3 = vpack.c.bf16 %v1051_v62, %v1051_v62 }
 0xd80   :  { %v1055_v33 = vrot.slane %v1052_v0, 7  ;;  %v1138_v5 = vpack.c.bf16 %v1052_v0, %v1052_v0 }
 0xd81   :  { %v1141_v6 = vunpack.c.l.b16 %v1137_v3 }
 0xd82   :  { %v1142_v7 = vunpack.c.l.b16 %v1138_v5  ;;  %v1057_v9 = vsel %vm1056_vm8, %v1055_v33, %v1051_v62  ;;  %v1215_v62 = vrot.slane %v2692_v39, 7 }
 0xd83   :  { %v1143_v13 = vrot.slane %v1141_v6, 4  ;;  %1058 = vrot.lane.b32.xlu0 %v1057_v9, %s2382_s3 }
 0xd84   :  { %v1144_v14 = vrot.slane %v1142_v7, 3 }
 0xd86   :  { %v1145_v51 = vsel %vm230_vm2, %v1144_v14, %v1143_v13 }
 0xd87   :  { %v934_v17 = vpop.permute.xlu0 %933  ;;  %v1146_v2 = vpack.c.b16 %v1145_v51, %v1145_v51 }
 0xd88   :  { %v936_v48 = vmul.f32 %v2260_v16, %v934_v17 }
 0xd89   :  { %1147 = vrot.lane.b32.xlu1 %v1146_v2, %s2382_s3 }
 0xd8a   :  { %v1062_v18 = vrot.slane %v936_v48, 4 }
 0xd8d   :  { %1063 = vrot.lane.b32.xlu1 %v1062_v18, %s2381_s13 }
 0xdf5   :  { %v1059_v20 = vpop.permute.xlu0 %1058 }
 0xdfb   :  { %v1148_v19 = vpop.permute.xlu1 %1147 }
 0xdfc   :  { %2071 = vmatmul.mubr.msk.bf16.vlgmr.msra.gmra.mrb[20].mxu1 %vm129_vm3, %v1148_v19 }
 0xdfd   :  { %2075 = vmatpush3.bf16.msra.mxu1 %v2487_v41  ;;  %2082 = vmatprep.mubr.msk.bf16.mxu1 %vm2379_vm0, %v2378_v1  ;;  %v2722_v41 = vld [vmem:[%s2902_s2] sm:$0xff]  }
 0xdfe   :  { %2076 = vmatprep.subr.bf16.mxu1 %v2378_v1 }
 0xdff   :  { %v1064_v21 = vpop.permute.xlu1 %1063 }
 0xe00   :  { %v1066_v4 = vsel %vm129_vm3, %v1059_v20, %v1064_v21 }
 0xe01   :  { %v1067_v22 = vpack.c.bf16 %v1066_v4, %v1066_v4  ;;  %2077 = vmatpush3.bf16.msra.mxu1 %v2493_v42  ;;  %v2733_v42 = vld [vmem:[%s2902_s2 + $0x8] sm:$0xff]  }
 0xe02   :  { %2078 = vmatprep.subr.bf16.mxu1 %v2378_v1 }
 0xe03   :  { %v1069_v54 = vrot.slane %v1067_v22, 2 }
 0xe05   :  { %2063 = vmatmul.mubr.msk.bf16.vlgmr.msra.gmra.mrb[20].mxu0 %vm261_vm4, %v1069_v54  ;;  %2079 = vmatpush3.bf16.msra.mxu1 %v2501_v44 }
 0xe06   :  { %2087 = vmatpush3.bf16.msra.mxu0 %v2722_v41  ;;  %2090 = vmatprep.mubr.msk.bf16.mxu0 %vm2379_vm0, %v2378_v1 }
 0xe07   :  { %2088 = vmatprep.subr.bf16.mxu0 %v2378_v1  ;;  %2080 = vmatprep.subr.bf16.mxu1 %v2378_v1 }
 0xe09   :  { %2081 = vmatpush3.bf16.msra.mxu1 %v2509_v45 }
 0xe0a   :  { %2089 = vmatpush3.bf16.msra.mxu0 %v2733_v42  ;;  %2106 = vmatprep.subr.bf16.mxu1 %v2378_v1 }
 0xe0b   :  { %2094 = vmatprep.subr.bf16.mxu0 %v2378_v1 }
 0xecf   :  { %v1186_v44 = vpop.f32.mrb[20].mxu1 }
 0xed0   :  { %v1193_v23 = vrot.slane %v1186_v44, 3  ;;  %v1194_v24 = vrot.slane %v1186_v44, 4  ;;  %v2072_v25 = vpop.f32.mrb[21].mxu1 }
 0xed1   :  { %v1189_v26 = vpop.f32.mrb[22].mxu1 }
 0xed2   :  { %v1197_v27 = vadd.f32 %v1193_v23, %v2469_v15  ;;  %v1198_v45 = vadd.f32 %v1194_v24, %v2467_v12  ;;  %v2073_v28 = vpop.f32.mrb[23].mxu1 }
 0xed4   :  { %2267 = vtanh.f32 %v1197_v27  ;;  %v1873_v40 = vmul.f32 -1.442695, %v1197_v27  ;;  %v1874_v43 = vmul.f32 -1.442695, %v1198_v45 }
 0xed5   :  { %2269 = vtanh.f32 %v1198_v45 }
 0xed8   :  { %v1107_v31 = vpop.f32.mrb[20].mxu0 }
 0xed9   :  { %v1108_v32 = vadd.f32 %v2540_v11, %v1107_v31  ;;  %v2064_v8 = vpop.f32.mrb[21].mxu0 }
 0xeda   :  { %v1110_v10 = vpop.f32.mrb[22].mxu0 }
 0xedb   :  { %2271 = vtanh.f32 %v1108_v32  ;;  %v2065_v34 = vpop.f32.mrb[23].mxu0  ;;  %v1871_v16 = vmul.f32 -1.442695, %v1108_v32  ;;  %v2771_v10 = vld [vmem:[%s2904_s4] sm:$0xff]  }
 0xedc   :  { %2273 = vpow2.f32 %v1873_v40  ;;  %v2780_v40 = vld [vmem:[%s2904_s4 + $0x8] sm:$0xff]  }
 0xedd   :  { %2275 = vpow2.f32 %v1874_v43 }
 0xede   :  { %v2268_v35 = vpop.eup %2267  ;;  %2277 = vpow2.f32 %v1871_v16  ;;  %v2789_v16 = vld [vmem:[%s2904_s4 + $0x10] sm:$0xff]  }
 0xedf   :  { %v2270_v37 = vpop.eup %2269  ;;  %1223 = vrot.lane.b32.xlu0 %v2268_v35, %s2381_s13 }
 0xee0   :  { %1225 = vrot.lane.b32.xlu1 %v2270_v37, %s2381_s13 }
 0xee5   :  { %v2272_v38 = vpop.eup %2271 }
 0xee6   :  { %1122 = vrot.lane.b32.xlu0 %v2272_v38, %s2381_s13  ;;  %v2274_v11 = vpop.eup %2273 }
 0xee7   :  { %v2276_v46 = vpop.eup %2275  ;;  %v1205_v47 = vadd.f32 1.0, %v2274_v11 }
 0xee8   :  { %v1206_v49 = vadd.f32 1.0, %v2276_v46  ;;  %v2278_v50 = vpop.eup %2277 }
 0xee9   :  { %2279 = vrcp.f32 %v1205_v47  ;;  %v1116_v52 = vadd.f32 1.0, %v2278_v50 }
 0xeea   :  { %2281 = vrcp.f32 %v1206_v49 }
 0xeeb   :  { %2283 = vrcp.f32 %v1116_v52 }
 0xef3   :  { %v2280_v53 = vpop.eup %2279 }
 0xef4   :  { %v2282_v55 = vpop.eup %2281  ;;  %v1219_v0 = vmul.f32 %v2280_v53, %v1215_v62 }
 0xef5   :  { %v2284_v60 = vpop.eup %2283  ;;  %v1220_v3 = vmul.f32 %v2282_v55, %v1216_v63 }
 0xef6   :  { %v1120_v9 = vmul.f32 %v2284_v60, %v2699_v59 }
 0xf51   :  { %v1224_v36 = vpop.permute.xlu0 %1223 }
 0xf52   :  { %v1226_v57 = vpop.permute.xlu1 %1225  ;;  %v1229_v58 = vmul.f32 %v2280_v53, %v1224_v36 }
 0xf53   :  { %v1230_v29 = vmul.f32 %v2282_v55, %v1226_v57 }
 0xf54   :  { %1233 = vrot.lane.b32.xlu1 %v1229_v58, %s2382_s3 }
 0xf55   :  { %1235 = vrot.lane.b32.xlu0 %v1230_v29, %s2382_s3 }
 0xf58   :  { %v1123_v30 = vpop.permute.xlu0 %1122 }
 0xf59   :  { %v1125_v61 = vmul.f32 %v2284_v60, %v1123_v30 }
 0xf5b   :  { %1127 = vrot.lane.b32.xlu1 %v1125_v61, %s2382_s3 }
 0xfc6   :  { %v1234_v33 = vpop.permute.xlu1 %1233 }
 0xfc7   :  { %v1236_v5 = vpop.permute.xlu0 %1235  ;;  %v2749_v6 = vadd.f32 %v1234_v33, %v1219_v0 }
 0xfc8   :  { %v2751_v7 = vadd.f32 %v1236_v5, %v1220_v3 }
 0xfc9   :  { %2285 = vtanh.f32 %v2749_v6 }
 0xfca   :  { %2287 = vtanh.f32 %v2751_v7 }
 0xfcd   :  { %v1128_v13 = vpop.permute.xlu1 %1127 }
 0xfce   :  { %v2756_v14 = vadd.f32 %v1128_v13, %v1120_v9 }
 0xfd0   :  { %2289 = vtanh.f32 %v2756_v14 }
 0xfd3   :  { %v2286_v39 = vpop.eup %2285 }
 0xfd4   :  { %v2288_v56 = vpop.eup %2287  ;;  %1245 = vrot.lane.b32.xlu0 %v2286_v39, %s2381_s13 }
 0xfd5   :  { %1247 = vrot.lane.b32.xlu1 %v2288_v56, %s2381_s13 }
 0xfda   :  { %v2290_v51 = vpop.eup %2289 }
 0xfdb   :  { %1133 = vrot.lane.b32.xlu0 %v2290_v51, %s2381_s13 }
0x1046   :  { %v1246_v17 = vpop.permute.xlu0 %1245 }
0x1047   :  { %v1248_v2 = vpop.permute.xlu1 %1247  ;;  %v1251_v48 = vmul.f32 %v2280_v53, %v1246_v17 }
0x1048   :  { %v1252_v18 = vmul.f32 %v2282_v55, %v1248_v2  ;;  %v2810_v55 = vld [vmem:[%s2905_s5] ss:$0 sm:$0xff] }
0x1049   :  { %v1343_v19 = vpack.c.bf16 %v1251_v48, %v1251_v48 }
0x104a   :  { %v1255_v59 = vrot.slane %v1252_v18, 7  ;;  %v1344_v20 = vpack.c.bf16 %v1252_v18, %v1252_v18 }
0x104b   :  { %v1347_v21 = vunpack.c.l.b16 %v1343_v19 }
0x104c   :  { %v1348_v4 = vunpack.c.l.b16 %v1344_v20  ;;  %v1257_v22 = vsel %vm1256_vm9, %v1255_v59, %v1251_v48 }
0x104d   :  { %v1349_v54 = vrot.slane %v1347_v21, 5  ;;  %1258 = vrot.lane.b32.xlu1 %v1257_v22, %s2382_s3  ;;  %v1134_v44 = vpop.permute.xlu0 %1133  ;;  %v1422_v22 = vrot.slane %v2751_v7, 7 }
0x104e   :  { %v1350_v23 = vrot.slane %v1348_v4, 4  ;;  %v1136_v24 = vmul.f32 %v2284_v60, %v1134_v44  ;;  %v1421_v4 = vrot.slane %v2749_v6, 7 }
0x1050   :  { %v1262_v25 = vrot.slane %v1136_v24, 3  ;;  %v1351_v26 = vsel %vm230_vm2, %v1350_v23, %v1349_v54 }
0x1051   :  { %v1352_v27 = vpack.c.b16 %v1351_v26, %v1351_v26 }
0x1052   :  { %1263 = vrot.lane.b32.xlu0 %v1262_v25, %s2381_s13 }
0x1053   :  { %1353 = vrot.lane.b32.xlu1 %v1352_v27, %s2382_s3 }
0x10bf   :  { %v1259_v45 = vpop.permute.xlu1 %1258 }
0x10c4   :  { %v1264_v28 = vpop.permute.xlu0 %1263 }
0x10c5   :  { %v1354_v31 = vpop.permute.xlu1 %1353  ;;  %v1266_v32 = vsel %vm129_vm3, %v1259_v45, %v1264_v28 }
0x10c6   :  { %v1267_v8 = vpack.c.bf16 %v1266_v32, %v1266_v32  ;;  %2091 = vmatmul.mubr.msk.bf16.vlgmr.msra.gmra.mrb[24].mxu0 %vm129_vm3, %v1354_v31 }
0x10c7   :  { %2095 = vmatpush3.bf16.msra.mxu0 %v2771_v10  ;;  %2102 = vmatprep.mubr.msk.bf16.mxu0 %vm2379_vm0, %v2378_v1 }
0x10c8   :  { %v1269_v34 = vshrl.u32 %v1267_v8, 16  ;;  %v1272_v35 = vshll.u32 %v1267_v8, 16  ;;  %2096 = vmatprep.subr.bf16.mxu0 %v2378_v1 }
0x10ca   :  { %v1271_v37 = vrot.slane %v1269_v34, 2  ;;  %v1274_v38 = vrot.slane %v1272_v35, 3 }
0x10cb   :  { %2097 = vmatpush3.bf16.msra.mxu0 %v2780_v40 }
0x10cc   :  { %v1275_v43 = vor.u32 %v1274_v38, %v1271_v37  ;;  %2098 = vmatprep.subr.bf16.mxu0 %v2378_v1 }
0x10ce   :  { %2083 = vmatmul.mubr.msk.bf16.vlgmr.msra.gmra.mrb[24].mxu1 %vm261_vm4, %v1275_v43 }
0x10cf   :  { %2107 = vmatpush3.bf16.msra.mxu1 %v2722_v41  ;;  %2099 = vmatpush3.bf16.msra.mxu0 %v2789_v16  ;;  %v2800_v41 = vld [vmem:[%s2904_s4 + $0x18] sm:$0xff]  }
0x10d0   :  { %2108 = vmatprep.subr.bf16.mxu1 %v2378_v1  ;;  %2110 = vmatprep.mubr.msk.bf16.mxu1 %vm2379_vm0, %v2378_v1 }
0x10d1   :  { %2100 = vmatprep.subr.bf16.mxu0 %v2378_v1 }
0x10d3   :  { %2109 = vmatpush3.bf16.msra.mxu1 %v2733_v42  ;;  %2101 = vmatpush3.bf16.msra.mxu0 %v2800_v41 }
0x10d4   :  { %2114 = vmatprep.subr.bf16.mxu1 %v2378_v1  ;;  %2126 = vmatprep.subr.bf16.mxu0 %v2378_v1 }
0x1199   :  { %v1392_v11 = vpop.f32.mrb[24].mxu0 }
0x119a   :  { %v1399_v46 = vrot.slane %v1392_v11, 2  ;;  %v1400_v47 = vrot.slane %v1392_v11, 3  ;;  %v2092_v49 = vpop.f32.mrb[25].mxu0 }
0x119b   :  { %v1395_v50 = vpop.f32.mrb[26].mxu0 }
0x119c   :  { %v1403_v52 = vadd.f32 %v1399_v46, %v2469_v15  ;;  %v1404_v42 = vadd.f32 %v1400_v47, %v2467_v12  ;;  %v2093_v53 = vpop.f32.mrb[27].mxu0 }
0x119e   :  { %2291 = vtanh.f32 %v1403_v52  ;;  %v1878_v63 = vmul.f32 -1.442695, %v1403_v52  ;;  %v1879_v0 = vmul.f32 -1.442695, %v1404_v42 }
0x119f   :  { %2293 = vtanh.f32 %v1404_v42 }
0x11a1   :  { %v1313_v36 = vpop.f32.mrb[24].mxu1 }
0x11a2   :  { %v1314_v57 = vadd.f32 %v2810_v55, %v1313_v36  ;;  %v2084_v58 = vpop.f32.mrb[25].mxu1 }
0x11a3   :  { %v1316_v29 = vpop.f32.mrb[26].mxu1 }
0x11a4   :  { %2295 = vtanh.f32 %v1314_v57  ;;  %v2085_v60 = vpop.f32.mrb[27].mxu1  ;;  %v1876_v3 = vmul.f32 -1.442695, %v1314_v57 }
0x11a5   :  { %2297 = vpow2.f32 %v1878_v63 }
0x11a6   :  { %2299 = vpow2.f32 %v1879_v0 }
0x11a7   :  { %2301 = vpow2.f32 %v1876_v3 }
0x11a8   :  { %v2292_v30 = vpop.eup %2291 }
0x11a9   :  { %v2294_v61 = vpop.eup %2293  ;;  %1429 = vrot.lane.b32.xlu0 %v2292_v30, %s2381_s13 }
0x11aa   :  { %1431 = vrot.lane.b32.xlu1 %v2294_v61, %s2381_s13 }
0x11ae   :  { %v2296_v62 = vpop.eup %2295 }
0x11af   :  { %1328 = vrot.lane.b32.xlu0 %v2296_v62, %s2381_s13  ;;  %v2298_v33 = vpop.eup %2297 }
0x11b0   :  { %v2300_v5 = vpop.eup %2299  ;;  %v1411_v9 = vadd.f32 1.0, %v2298_v33 }
0x11b1   :  { %v1412_v13 = vadd.f32 1.0, %v2300_v5  ;;  %v2302_v39 = vpop.eup %2301 }
0x11b2   :  { %2303 = vrcp.f32 %v1411_v9  ;;  %v1322_v56 = vadd.f32 1.0, %v2302_v39 }
0x11b3   :  { %2305 = vrcp.f32 %v1412_v13 }
0x11b4   :  { %2307 = vrcp.f32 %v1322_v56 }
0x11bc   :  { %v2304_v51 = vpop.eup %2303 }
0x11bd   :  { %v2306_v2 = vpop.eup %2305  ;;  %v1425_v54 = vmul.f32 %v2304_v51, %v1421_v4 }
0x11be   :  { %v2308_v59 = vpop.eup %2307  ;;  %v1426_v23 = vmul.f32 %v2306_v2, %v1422_v22 }
0x11bf   :  { %v1326_v27 = vmul.f32 %v2308_v59, %v2756_v14 }
0x121b   :  { %v1430_v17 = vpop.permute.xlu0 %1429 }
0x121c   :  { %v1432_v48 = vpop.permute.xlu1 %1431  ;;  %v1435_v18 = vmul.f32 %v2304_v51, %v1430_v17 }
0x121d   :  { %v1436_v19 = vmul.f32 %v2306_v2, %v1432_v48 }
0x121e   :  { %1439 = vrot.lane.b32.xlu1 %v1435_v18, %s2382_s3 }
0x121f   :  { %1441 = vrot.lane.b32.xlu0 %v1436_v19, %s2382_s3 }
0x1221   :  { %v1329_v20 = vpop.permute.xlu0 %1328 }
0x1222   :  { %v1331_v21 = vmul.f32 %v2308_v59, %v1329_v20 }
0x1224   :  { %1333 = vrot.lane.b32.xlu1 %v1331_v21, %s2382_s3 }
0x1290   :  { %v1440_v44 = vpop.permute.xlu1 %1439 }
0x1291   :  { %v2821_v24 = vadd.f32 %v1440_v44, %v1425_v54  ;;  %v1442_v25 = vpop.permute.xlu0 %1441 }
0x1292   :  { %v2823_v26 = vadd.f32 %v1442_v25, %v1426_v23 }
0x1293   :  { %2309 = vtanh.f32 %v2821_v24 }
0x1294   :  { %2311 = vtanh.f32 %v2823_v26 }
0x1296   :  { %v1334_v45 = vpop.permute.xlu1 %1333 }
0x1297   :  { %v2828_v28 = vadd.f32 %v1334_v45, %v1326_v27 }
0x1299   :  { %2313 = vtanh.f32 %v2828_v28 }
0x129d   :  { %v2310_v6 = vpop.eup %2309 }
0x129e   :  { %v2312_v7 = vpop.eup %2311  ;;  %1451 = vrot.lane.b32.xlu0 %v2310_v6, %s2381_s13 }
0x129f   :  { %1453 = vrot.lane.b32.xlu1 %v2312_v7, %s2381_s13  ;;  %v1622_v7 = vrot.slane %v2823_v26, 7 }
0x12a3   :  { %v2314_v31 = vpop.eup %2313 }
0x12a4   :  { %1339 = vrot.lane.b32.xlu0 %v2314_v31, %s2381_s13 }
0x1310   :  { %v1452_v32 = vpop.permute.xlu0 %1451 }
0x1311   :  { %v1457_v8 = vmul.f32 %v2304_v51, %v1452_v32  ;;  %v1454_v34 = vpop.permute.xlu1 %1453 }
0x1312   :  { %v1458_v35 = vmul.f32 %v2306_v2, %v1454_v34 }
0x1313   :  { %v1543_v37 = vpack.c.bf16 %v1457_v8, %v1457_v8 }
0x1314   :  { %v1461_v14 = vrot.slane %v1458_v35, 7  ;;  %v1544_v38 = vpack.c.bf16 %v1458_v35, %v1458_v35 }
0x1315   :  { %v1547_v43 = vunpack.c.l.b16 %v1543_v37  ;;  %v1621_v37 = vrot.slane %v2821_v24, 7 }
0x1316   :  { %v1548_v11 = vunpack.c.l.b16 %v1544_v38  ;;  %v1463_v46 = vsel %vm1462_vm10, %v1461_v14, %v1457_v8  ;;  %v1340_v47 = vpop.permute.xlu0 %1339 }
0x1317   :  { %v1549_v49 = vrot.slane %v1547_v43, 6  ;;  %1464 = vrot.lane.b32.xlu1 %v1463_v46, %s2382_s3  ;;  %v1342_v50 = vmul.f32 %v2308_v59, %v1340_v47 }
0x1318   :  { %v1550_v52 = vrot.slane %v1548_v11, 5 }
0x1319   :  { %v1468_v42 = vrot.slane %v1342_v50, 2 }
0x131a   :  { %v1551_v53 = vsel %vm230_vm2, %v1550_v52, %v1549_v49 }
0x131b   :  { %v1552_v36 = vpack.c.b16 %v1551_v53, %v1551_v53  ;;  %1469 = vrot.lane.b32.xlu0 %v1468_v42, %s2381_s13 }
0x131d   :  { %1553 = vrot.lane.b32.xlu1 %v1552_v36, %s2382_s3 }
0x1389   :  { %v1465_v57 = vpop.permute.xlu1 %1464 }
0x138d   :  { %v1470_v58 = vpop.permute.xlu0 %1469 }
0x138e   :  { %v1472_v29 = vsel %vm129_vm3, %v1465_v57, %v1470_v58 }
0x138f   :  { %v1554_v60 = vpop.permute.xlu1 %1553  ;;  %v1473_v30 = vpack.c.bf16 %v1472_v29, %v1472_v29 }
0x1390   :  { %2111 = vmatmul.mubr.msk.bf16.vlgmr.msra.gmra.mrb[28].mxu1 %vm129_vm3, %v1554_v60 }
0x1391   :  { %v1475_v61 = vrot.slane %v1473_v30, 3  ;;  %2115 = vmatpush3.bf16.msra.mxu1 %v2771_v10  ;;  %2122 = vmatprep.mubr.msk.bf16.mxu1 %vm2379_vm0, %v2378_v1 }
0x1392   :  { %2116 = vmatprep.subr.bf16.mxu1 %v2378_v1 }
0x1393   :  { %2103 = vmatmul.mubr.msk.bf16.vlgmr.msra.gmra.mrb[28].mxu0 %vm261_vm4, %v1475_v61 }
0x1394   :  { %2130 = vmatprep.mubr.msk.bf16.mxu0 %vm2379_vm0, %v2378_v1 }
0x1395   :  { %2117 = vmatpush3.bf16.msra.mxu1 %v2780_v40 }
0x1396   :  { %2118 = vmatprep.subr.bf16.mxu1 %v2378_v1 }
0x1399   :  { %2119 = vmatpush3.bf16.msra.mxu1 %v2789_v16 }
0x139a   :  { %2120 = vmatprep.subr.bf16.mxu1 %v2378_v1 }
0x139d   :  { %2121 = vmatpush3.bf16.msra.mxu1 %v2800_v41 }
0x1463   :  { %v1592_v10 = vpop.f32.mrb[28].mxu1 }
0x1464   :  { %v1600_v62 = vrot.slane %v1592_v10, 2  ;;  %v2112_v63 = vpop.f32.mrb[29].mxu1  ;;  %v1599_v39 = vrot.slane %v1592_v10, 1 }
0x1465   :  { %v1595_v0 = vpop.f32.mrb[30].mxu1 }
0x1466   :  { %v1604_v3 = vadd.f32 %v1600_v62, %v2467_v12  ;;  %v2113_v33 = vpop.f32.mrb[31].mxu1  ;;  %v1513_v5 = vpop.f32.mrb[28].mxu0  ;;  %v1603_v16 = vadd.f32 %v1599_v39, %v2469_v15 }
0x1467   :  { %v2104_v9 = vpop.f32.mrb[29].mxu0  ;;  %v1514_v40 = vadd.f32 %v2810_v55, %v1513_v5 }
0x1468   :  { %v1516_v13 = vpop.f32.mrb[30].mxu0  ;;  %2315 = vtanh.f32 %v1604_v3  ;;  %v1884_v17 = vmul.f32 -1.442695, %v1604_v3  ;;  %v1883_v48 = vmul.f32 -1.442695, %v1603_v16 }
0x1469   :  { %v2105_v56 = vpop.f32.mrb[31].mxu0  ;;  %2317 = vtanh.f32 %v1514_v40  ;;  %v1881_v2 = vmul.f32 -1.442695, %v1514_v40 }
0x146a   :  { %2319 = vtanh.f32 %v1603_v16 }
0x146b   :  { %2321 = vpow2.f32 %v1884_v17 }
0x146c   :  { %2323 = vpow2.f32 %v1881_v2 }
0x146d   :  { %2325 = vpow2.f32 %v1883_v48 }
0x1472   :  { %v2316_v41 = vpop.eup %2315 }
0x1473   :  { %1631 = vrot.lane.b32.xlu1 %v2316_v41, %s2381_s13  ;;  %v2318_v51 = vpop.eup %2317 }
0x1474   :  { %1528 = vrot.lane.b32.xlu0 %v2318_v51, %s2381_s13  ;;  %v2320_v12 = vpop.eup %2319 }
0x1475   :  { %v2322_v18 = vpop.eup %2321 }
0x1476   :  { %v1612_v19 = vadd.f32 1.0, %v2322_v18  ;;  %v2324_v15 = vpop.eup %2323 }
0x1477   :  { %v1522_v59 = vadd.f32 1.0, %v2324_v15  ;;  %v2326_v20 = vpop.eup %2325  ;;  %v2153_v15 = vld [vmem:[%s2906_s6] sm:$0xff]  }
0x1478   :  { %1629 = vrot.lane.b32.xlu0 %v2320_v12, %s2381_s13  ;;  %2327 = vrcp.f32 %v1612_v19  ;;  %v1611_v21 = vadd.f32 1.0, %v2326_v20  ;;  %2127 = vmatpush3.bf16.msra.mxu0 %v2153_v15 }
0x1479   :  { %2329 = vrcp.f32 %v1522_v59  ;;  %v2154_v59 = vld [vmem:[%s2906_s6 + $0x8] sm:$0xff]   ;;  %2128 = vmatprep.subr.bf16.mxu0 %v2378_v1  ;;  %s1829_s6 = sshll.u32 %s2383_s18, 4  ;;  %s1830_s6 = int_to_ptr.vmem [resolvable:$true] %s1829_s6 }
0x147a   :  { %2331 = vrcp.f32 %v1611_v21  ;;  %p2359_p1 = scmp.lt.s32.totalorder %s1830_s6, %s1830_s6 }
0x147c   :  { %2129 = vmatpush3.bf16.msra.mxu0 %v2154_v59 }
0x1482   :  { %v2328_v4 = vpop.eup %2327 }
0x1483   :  { %v2330_v44 = vpop.eup %2329  ;;  %v1626_v31 = vmul.f32 %v2328_v4, %v1622_v7 }
0x1484   :  { %v2332_v27 = vpop.eup %2331  ;;  %v1526_v34 = vmul.f32 %v2330_v44, %v2828_v28 }
0x1485   :  { %v1625_v38 = vmul.f32 %v2332_v27, %v1621_v37 }
0x14e5   :  { %v1632_v22 = vpop.permute.xlu1 %1631 }
0x14e6   :  { %v1636_v54 = vmul.f32 %v2328_v4, %v1632_v22  ;;  %v1529_v23 = vpop.permute.xlu0 %1528 }
0x14e7   :  { %v1531_v25 = vmul.f32 %v2330_v44, %v1529_v23 }
0x14e8   :  { %1641 = vrot.lane.b32.xlu0 %v1636_v54, %s2382_s3 }
0x14e9   :  { %1533 = vrot.lane.b32.xlu1 %v1531_v25, %s2382_s3 }
0x14ea   :  { %v1630_v45 = vpop.permute.xlu0 %1629 }
0x14eb   :  { %v1635_v6 = vmul.f32 %v2332_v27, %v1630_v45 }
0x14ed   :  { %1639 = vrot.lane.b32.xlu1 %v1635_v6, %s2382_s3 }
0x155a   :  { %v1642_v32 = vpop.permute.xlu0 %1641 }
0x155b   :  { %v1646_v8 = vadd.f32 %v1642_v32, %v1626_v31  ;;  %v1534_v35 = vpop.permute.xlu1 %1533 }
0x155c   :  { %v1536_v14 = vadd.f32 %v1534_v35, %v1526_v34 }
0x155d   :  { %2333 = vtanh.f32 %v1646_v8 }
0x155e   :  { %2335 = vtanh.f32 %v1536_v14 }
0x155f   :  { %v1640_v43 = vpop.permute.xlu1 %1639 }
0x1560   :  { %v1645_v11 = vadd.f32 %v1640_v43, %v1625_v38 }
0x1562   :  { %2337 = vtanh.f32 %v1645_v11 }
0x1567   :  { %v2334_v46 = vpop.eup %2333 }
0x1568   :  { %1653 = vrot.lane.b32.xlu1 %v2334_v46, %s2381_s13  ;;  %v2336_v47 = vpop.eup %2335 }
0x1569   :  { %1539 = vrot.lane.b32.xlu0 %v2336_v47, %s2381_s13 }
0x156c   :  { %v2338_v26 = vpop.eup %2337 }
0x156d   :  { %1651 = vrot.lane.b32.xlu0 %v2338_v26, %s2381_s13 }
0x15da   :  { %v1654_v49 = vpop.permute.xlu1 %1653 }
0x15db   :  { %v1540_v28 = vpop.permute.xlu0 %1539  ;;  %v1658_v50 = vmul.f32 %v2328_v4, %v1654_v49 }
0x15dc   :  { %v1542_v52 = vmul.f32 %v2330_v44, %v1540_v28  ;;  %v1887_v44 = vld [vmem:[%s2907_s7] ss:$0 sm:$0xff] }
0x15dd   :  { %v1661_v53 = vrot.slane %v1658_v50, 7 }
0x15de   :  { %v1669_v24 = vrot.slane %v1542_v52, 1 }
0x15df   :  { %v1652_v42 = vpop.permute.xlu0 %1651 }
0x15e0   :  { %v1657_v36 = vmul.f32 %v2332_v27, %v1652_v42  ;;  %1670 = vrot.lane.b32.xlu0 %v1669_v24, %s2381_s13 }
0x15e2   :  { %v2140_v57 = vpack.i.bf16 %v1661_v53, %v1657_v36 }
0x15e4   :  { %2141 = vrot.lane.b32.xlu1 %v2140_v57, %s2382_s3 }
0x1652   :  { %v1671_v30 = vpop.permute.xlu0 %1670 }
0x1656   :  { %v2142_v58 = vpop.permute.xlu1 %2141 }
0x1657   :  { %v2144_v29 = vunpack.i.h.bf16 %v2142_v58  ;;  %v2143_v60 = vunpack.i.l.bf16 %v2142_v58 }
0x1659   :  { %v1673_v61 = vsel %vm129_vm3, %v2143_v60, %v1671_v30  ;;  %v1674_v10 = vsel %vm129_vm3, %v2144_v29, %v1671_v30 }
0x165a   :  { %v1675_v62 = vpack.c.bf16 %v1674_v10, %v1673_v61 }
0x165c   :  { %v1677_v63 = vshrl.u32 %v1675_v62, 16  ;;  %v1680_v0 = vshll.u32 %v1675_v62, 16 }
0x165e   :  { %v1679_v3 = vrot.slane %v1677_v63, 3  ;;  %v1682_v33 = vrot.slane %v1680_v0, 4 }
0x1660   :  { %v1683_v5 = vor.u32 %v1682_v33, %v1679_v3 }
0x1662   :  { %2123 = vmatmul.mubr.msk.bf16.vlgmr.msra.gmra.mrb[32].mxu1 %vm261_vm4, %v1683_v5 }
0x1735   :  { %v1721_v9 = vpop.f32.mrb[32].mxu1 }
0x1736   :  { %v1722_v13 = vadd.f32 %v2810_v55, %v1721_v9  ;;  %v2124_v39 = vpop.f32.mrb[33].mxu1 }
0x1737   :  { %v1724_v40 = vpop.f32.mrb[34].mxu1 }
0x1738   :  { %2339 = vtanh.f32 %v1722_v13  ;;  %v2125_v56 = vpop.f32.mrb[35].mxu1  ;;  %v1886_v41 = vmul.f32 -1.442695, %v1722_v13 }
0x173a   :  { %2341 = vpow2.f32 %v1886_v41 }
0x1742   :  { %v2340_v16 = vpop.eup %2339 }
0x1743   :  { %1736 = vrot.lane.b32.xlu1 %v2340_v16, %s2381_s13 }
0x1744   :  { %v2342_v51 = vpop.eup %2341 }
0x1745   :  { %v1730_v12 = vadd.f32 1.0, %v2342_v51 }
0x1747   :  { %2343 = vrcp.f32 %v1730_v12 }
0x1751   :  { %v2344_v17 = vpop.eup %2343 }
0x1752   :  { %v1734_v18 = vmul.f32 %v2344_v17, %v1536_v14 }
0x17b5   :  { %v1737_v2 = vpop.permute.xlu1 %1736 }
0x17b6   :  { %v1739_v48 = vmul.f32 %v2344_v17, %v1737_v2 }
0x17b8   :  { %1741 = vrot.lane.b32.xlu0 %v1739_v48, %s2382_s3 }
0x182a   :  { %v1742_v19 = vpop.permute.xlu0 %1741 }
0x182b   :  { %v1744_v55 = vadd.f32 %v1742_v19, %v1734_v18 }
0x182d   :  { %2345 = vtanh.f32 %v1744_v55 }
0x1837   :  { %v2346_v20 = vpop.eup %2345 }
0x1838   :  { %1747 = vrot.lane.b32.xlu1 %v2346_v20, %s2381_s13  ;;  %s2354_s13 = scalar_lea.vmem %s1830_s6, 32 }
0x1839   :  { %p2355_p0 = scmp.ne.s32.totalorder %s1830_s6, %s2354_s13  ;;  %p2360_p2 = scmp.lt.s32.totalorder %s2354_s13, %s2354_s13 }
0x183b   :  { %p2361_p3 = por %p2360_p2, %p2359_p1 }
0x183d   :  { %p2362_p4 = pnand %p2361_p3, %p2355_p0 }
0x18aa   :  { %v1748_v21 = vpop.permute.xlu1 %1747 }
0x18ab   :  { %v1750_v4 = vmul.f32 %v2344_v17, %v1748_v21 }
0x18ad   :  { %v1751_v22 = vpack.c.bf16 %v1750_v4, %v1750_v4 }
0x18af   :  { %1764 = vrot.lane.b32.xlu0 %v1751_v22, %s2382_s3 }
0x1921   :  { %v1765_v54 = vpop.permute.xlu0 %1764 }
0x1922   :  { %2131 = vmatmul.mubr.msk.bf16.vlgmr.msra.gmra.mrb[32].mxu0 %vm129_vm3, %v1765_v54 }
0x19f5   :  { %v1815_v23 = vpop.f32.mrb[32].mxu0 }
0x19f6   :  { %v1816_v1 = vadd.f32 %v1887_v44, %v1815_v23  ;;  %v2132_v25 = vpop.f32.mrb[33].mxu0 }
0x19f7   :  { %v1818_v27 = vpop.f32.mrb[34].mxu0 }
0x19f8   :  { %v2133_v45 = vpop.f32.mrb[35].mxu0  ;;  %1822 = vst.msk [vmem:[#allocation2] sm:$0x3] %vm1821_vm11, %v1816_v1 }
0x19f9   :  { %2365 = shalt.err (!%p2362_p4)
}
0x19fa   :  { %s2366_s7 = scalar_lea.hbm %s2908_s8, 32 }
0x19fb   :  { %p2367_p5 = scmp.ne.s32.totalorder %s2908_s8, %s2366_s7  ;;  %p2370_p6 = scmp.lt.u32.totalorder %s2366_s7, %s2908_s8 }
0x19fd   :  { %p2372_p7 = pnand %p2370_p6, %p2367_p5 }
0x19ff   :  { %2375 = shalt.err (!%p2372_p7)
}
0x1a00   :  { %1832 = dma.vmem_to_hbm [thread:$0]  %s1830_s6, 32, %s2908_s8, [#allocation3]  }
0x1a01   :  { %2376 = dma.done.wait [#allocation3], 32  }
0x1a02   :  { %2377 = vsyncadd [#allocation3], 4294967264 }
0x1a03   :  { %1836 = vsyncpa [#allocation3], 1 }

</bundles_post_ra>
